<compile_context>
chip_gen: v7x
topology: tpu7x:2x2x1
jax: 0.10.0
libtpu: 0.0.40
codegen_flags: <defaults>
</compile_context>

<pallas_src>
import jax
import jax.numpy as jnp
from jax.experimental import pallas as pl
from jax.experimental.pallas import tpu as pltpu

# ---------------------------------------------------------------------------
# Small stand-in shapes consistent with the post-backbone forward pass.
# (Real model: D_ESM = D_PP = 1280, L up to ~1k; the same single-block-per-
#  batch-element structure applies unchanged at those sizes.)
# ---------------------------------------------------------------------------
B = 2
L_ESM = 256        # ESM2 sequence length (stand-in)
D_ESM = 32         # stand-in for ESM2 hidden dim (real module: 1280)
L_PP = 64          # PromptProtein sequence length (stand-in, independent of L_ESM)
D_PP = 64          # stand-in for PromptProtein logits dim (real module: 1280)
NUM_CLASSES = 8    # configs.encoder.num_classes (stand-in)

# TODO(synk): the pretrained ESM2 / PromptProtein backbones are not translated;
# their outputs are replaced by deterministic synthetic hidden states below.


def _bothmodels_kernel(esm_ref, pp_ref, w_cs_ref, b_cs_ref,
                       w_head_esm_ref, w_head_pp_ref, b_head_ref,
                       cls_ref, cs_ref):
    # bf16 tiles straight from the pipeline; no full-tile f32 copy is made.
    esm = esm_ref[0]                       # (L_ESM, D_ESM) bf16
    pp = pp_ref[0]                         # (L_PP,  D_PP)  bf16

    # AdaptiveAvgPool1d(1) == mean over the sequence axis.
    # Done on the (otherwise idle) MXU as ones(1, L) @ X(L, D) with f32
    # accumulation, freeing VPU slots; the 1/L scale is one multiply.
    ones_esm = jnp.ones((1, L_ESM), dtype=esm.dtype)
    pooled_esm = jnp.dot(ones_esm, esm,
                         preferred_element_type=jnp.float32) * (1.0 / L_ESM)
    ones_pp = jnp.ones((1, L_PP), dtype=pp.dtype)
    pooled_pp = jnp.dot(ones_pp, pp,
                        preferred_element_type=jnp.float32) * (1.0 / L_PP)

    # cs_head: nn.Linear(D_ESM, 1) applied token-wise, squeeze(-1).
    # VPU broadcast-multiply + lane (D) reduction; the bf16->f32 upcast is
    # inlined in this single expression (fused per-vreg, no persistent f32
    # tile).  Bias is a scalar read from SMEM.
    w_cs_row = w_cs_ref[...]                                            # (1, D_ESM) f32
    cs = jnp.sum(esm.astype(jnp.float32) * w_cs_row, axis=-1) + b_cs_ref[0]  # (L_ESM,)
    cs_ref[...] = cs.reshape(1, 1, L_ESM)      # lane-dense (multiple-of-128) store

    # head: nn.Linear(D_ESM + D_PP, NUM_CLASSES) on concat(pooled_esm, pooled_pp).
    # The concat is folded into a split weight; tiny (1, C) result stored as-is.
    cls = (jnp.dot(pooled_esm, w_head_esm_ref[...],
                   preferred_element_type=jnp.float32)
           + jnp.dot(pooled_pp, w_head_pp_ref[...],
                     preferred_element_type=jnp.float32)
           + b_head_ref[...])                                           # (1, NUM_CLASSES)
    cls_ref[...] = cls.reshape(1, 1, NUM_CLASSES)


def prepare_head_params(w_cs, b_cs, w_head, b_head):
    """One-time weight layout prep (hoisted out of the per-call path)."""
    w_cs_row = w_cs.reshape(1, D_ESM).astype(jnp.float32)
    b_cs_1d = b_cs.reshape(1).astype(jnp.float32)
    # Split the head weight at the concat boundary; no column padding in HBM.
    w_head_esm = w_head[:D_ESM, :].astype(jnp.float32)
    w_head_pp = w_head[D_ESM:, :].astype(jnp.float32)
    b_head_row = b_head.reshape(1, NUM_CLASSES).astype(jnp.float32)
    return w_cs_row, b_cs_1d, w_head_esm, w_head_pp, b_head_row


@jax.jit
def bothmodels_forward(esm_hidden, pp_logits,
                       w_cs_row, b_cs_1d, w_head_esm, w_head_pp, b_head_row):
    """Fused Pallas forward of everything downstream of the two backbones.

    Returns (classification_head, cs_pred) exactly like Bothmodels.forward.
    """
    # Memory-bound streaming inputs: store as bf16 (halves HBM traffic).
    esm_bf16 = esm_hidden.astype(jnp.bfloat16)
    pp_bf16 = pp_logits.astype(jnp.bfloat16)

    cls3, cs3 = pl.pallas_call(
        _bothmodels_kernel,
        out_shape=(
            jax.ShapeDtypeStruct((B, 1, NUM_CLASSES), jnp.float32),
            jax.ShapeDtypeStruct((B, 1, L_ESM), jnp.float32),
        ),
        grid_spec=pltpu.PrefetchScalarGridSpec(
            num_scalar_prefetch=0,
            grid=(B,),
            in_specs=[
                # Full (1, L, D) block per batch element; no L-tiling needed.
                pl.BlockSpec((1, L_ESM, D_ESM), lambda b: (b, 0, 0)),
                pl.BlockSpec((1, L_PP, D_PP), lambda b: (b, 0, 0)),
                pl.BlockSpec((1, D_ESM), lambda b: (0, 0)),
                pl.BlockSpec(memory_space=pltpu.MemorySpace.SMEM),   # b_cs scalar
                pl.BlockSpec((D_ESM, NUM_CLASSES), lambda b: (0, 0)),
                pl.BlockSpec((D_PP, NUM_CLASSES), lambda b: (0, 0)),
                pl.BlockSpec((1, NUM_CLASSES), lambda b: (0, 0)),
            ],
            out_specs=[
                pl.BlockSpec((1, 1, NUM_CLASSES), lambda b: (b, 0, 0)),
                pl.BlockSpec((1, 1, L_ESM), lambda b: (b, 0, 0)),
            ],
        ),
        compiler_params=pltpu.CompilerParams(
            # B split across TensorCores on v7x (v5e/v6e: single TC, no-op).
            dimension_semantics=("parallel",),
            # Generation-safe explicit limit (<= every chip's scoped default
            # headroom); real-shape blocks fit with large margin.
            vmem_limit_bytes=32 * 1024 * 1024,
        ),
    )(esm_bf16, pp_bf16, w_cs_row, b_cs_1d, w_head_esm, w_head_pp, b_head_row)

    cls = cls3[:, 0, :]
    cs = cs3[:, 0, :]
    # cs_pred = cs_head[:, 1:201]  (PyTorch slicing clamps to the seq length)
    cs_pred = cs[:, 1:min(201, L_ESM)]
    return cls, cs_pred


def _reference(esm_hidden, pp_logits, w_cs, b_cs, w_head, b_head):
    # Mirror the kernel's bf16 rounding of the streamed activations.
    esm = esm_hidden.astype(jnp.bfloat16).astype(jnp.float32)
    pp = pp_logits.astype(jnp.bfloat16).astype(jnp.float32)
    pooled_esm = jnp.mean(esm, axis=1)
    pooled_pp = jnp.mean(pp, axis=1)
    cs = jnp.sum(esm * w_cs[:, 0][None, None, :], axis=-1) + b_cs[0]
    cs_pred = cs[:, 1:min(201, L_ESM)]
    pooled = jnp.concatenate([pooled_esm, pooled_pp], axis=1)
    cls = jnp.dot(pooled, w_head, precision=jax.lax.Precision.HIGHEST) + b_head
    return cls, cs_pred


if __name__ == "__main__":
    key = jax.random.PRNGKey(0)
    k1, k2, k3, k4, k5, k6 = jax.random.split(key, 6)

    # Synthetic backbone outputs (stand-ins for the pretrained models).
    esm_hidden = jax.random.normal(k1, (B, L_ESM, D_ESM), dtype=jnp.float32)
    pp_logits = jax.random.normal(k2, (B, L_PP, D_PP), dtype=jnp.float32)

    # Deterministic head parameters (shapes from the module's __init__).
    w_cs = jax.random.normal(k3, (D_ESM, 1), dtype=jnp.float32) * 0.05     # cs_head
    b_cs = jax.random.normal(k4, (1,), dtype=jnp.float32) * 0.05
    w_head = jax.random.normal(k5, (D_ESM + D_PP, NUM_CLASSES), dtype=jnp.float32) * 0.05
    b_head = jax.random.normal(k6, (NUM_CLASSES,), dtype=jnp.float32) * 0.05

    params = prepare_head_params(w_cs, b_cs, w_head, b_head)
    cls_out, cs_pred = bothmodels_forward(esm_hidden, pp_logits, *params)
    jax.block_until_ready((cls_out, cs_pred))

    cls_ref, cs_ref = _reference(esm_hidden, pp_logits, w_cs, b_cs, w_head, b_head)
    assert cls_out.shape == (B, NUM_CLASSES)
    assert cs_pred.shape == (B, min(200, L_ESM - 1))
    assert jnp.allclose(cs_pred, cs_ref, atol=1e-4, rtol=1e-4), "cs mismatch"
    assert jnp.allclose(cls_out, cls_ref, atol=1e-3, rtol=1e-3), "cls mismatch"
    print("KERNEL_OK")
</pallas_src>

<mosaic_0001>
module attributes {stable_mosaic.version = 11 : i64} {
  func.func @_bothmodels_kernel(%arg0: i32, %arg1: memref<1x256x32xbf16, #tpu.memory_space<vmem>>, %arg2: memref<1x64x64xbf16, #tpu.memory_space<vmem>>, %arg3: memref<1x32xf32, #tpu.memory_space<vmem>>, %arg4: memref<1xf32, #tpu.memory_space<smem>>, %arg5: memref<32x8xf32, #tpu.memory_space<vmem>>, %arg6: memref<64x8xf32, #tpu.memory_space<vmem>>, %arg7: memref<1x8xf32, #tpu.memory_space<vmem>>, %arg8: memref<1x1x8xf32, #tpu.memory_space<vmem>>, %arg9: memref<1x1x256xf32, #tpu.memory_space<vmem>>) attributes {dimension_semantics = [#tpu.dimension_semantics<parallel>], iteration_bounds = array<i64: 2>, scalar_prefetch = 0 : i64, scratch_operands = 0 : i64, tpu.core_type = #tpu.core_type<tc>, window_params = [{transform_indices = @transform_0, window_bounds = array<i64: 1, 256, 32>}, {transform_indices = @transform_1, window_bounds = array<i64: 1, 64, 64>}, {pipeline_mode = #tpu.pipeline_mode<synchronous>, transform_indices = @transform_2, window_bounds = array<i64: 1, 32>}, {transform_indices = @transform_3, window_bounds = array<i64: 1>}, {pipeline_mode = #tpu.pipeline_mode<synchronous>, transform_indices = @transform_4, window_bounds = array<i64: 32, 8>}, {pipeline_mode = #tpu.pipeline_mode<synchronous>, transform_indices = @transform_5, window_bounds = array<i64: 64, 8>}, {pipeline_mode = #tpu.pipeline_mode<synchronous>, transform_indices = @transform_6, window_bounds = array<i64: 1, 8>}, {transform_indices = @transform_7, window_bounds = array<i64: 1, 1, 8>}, {transform_indices = @transform_8, window_bounds = array<i64: 1, 1, 256>}]} {
    %c0 = arith.constant 0 : index
    %c0_0 = arith.constant 0 : index
    %c0_1 = arith.constant 0 : index
    %0 = vector.load %arg1[%c0, %c0_0, %c0_1] : memref<1x256x32xbf16, #tpu.memory_space<vmem>>, vector<1x256x32xbf16>
    %1 = vector.shape_cast %0 : vector<1x256x32xbf16> to vector<256x32xbf16>
    %c0_2 = arith.constant 0 : index
    %c0_3 = arith.constant 0 : index
    %c0_4 = arith.constant 0 : index
    %2 = vector.load %arg2[%c0_2, %c0_3, %c0_4] : memref<1x64x64xbf16, #tpu.memory_space<vmem>>, vector<1x64x64xbf16>
    %3 = vector.shape_cast %2 : vector<1x64x64xbf16> to vector<64x64xbf16>
    %cst = arith.constant 1.000000e+00 : bf16
    %4 = vector.broadcast %cst : bf16 to vector<1x256xbf16>
    %cst_5 = arith.constant dense<0.000000e+00> : vector<1x32xf32>
    %5 = tpu.matmul %4, %1, %cst_5 {dimension_numbers = #tpu.dot_dimension_numbers<[1], [0], [0], [1], [0, 0, 1, 1], [], []>} : vector<1x256xbf16>, vector<256x32xbf16>, vector<1x32xf32> -> vector<1x32xf32>
    %cst_6 = arith.constant 3.906250e-03 : f32
    %6 = vector.broadcast %cst_6 : f32 to vector<1x32xf32>
    %7 = arith.mulf %5, %6 : vector<1x32xf32>
    %cst_7 = arith.constant 1.000000e+00 : bf16
    %8 = vector.broadcast %cst_7 : bf16 to vector<1x64xbf16>
    %cst_8 = arith.constant dense<0.000000e+00> : vector<1x64xf32>
    %9 = tpu.matmul %8, %3, %cst_8 {dimension_numbers = #tpu.dot_dimension_numbers<[1], [0], [0], [1], [0, 0, 1, 1], [], []>} : vector<1x64xbf16>, vector<64x64xbf16>, vector<1x64xf32> -> vector<1x64xf32>
    %cst_9 = arith.constant 1.562500e-02 : f32
    %10 = vector.broadcast %cst_9 : f32 to vector<1x64xf32>
    %11 = arith.mulf %9, %10 : vector<1x64xf32>
    %c0_10 = arith.constant 0 : index
    %c0_11 = arith.constant 0 : index
    %12 = vector.load %arg3[%c0_10, %c0_11] : memref<1x32xf32, #tpu.memory_space<vmem>>, vector<1x32xf32>
    %13 = arith.extf %1 : vector<256x32xbf16> to vector<256x32xf32>
    %14 = vector.broadcast %12 : vector<1x32xf32> to vector<256x32xf32>
    %15 = arith.mulf %13, %14 : vector<256x32xf32>
    %cst_12 = arith.constant dense<0.000000e+00> : vector<256xf32>
    %16 = vector.multi_reduction <add>, %15, %cst_12 [1] : vector<256x32xf32> to vector<256xf32>
    %c0_13 = arith.constant 0 : index
    %17 = memref.load %arg4[%c0_13] : memref<1xf32, #tpu.memory_space<smem>>
    %18 = vector.broadcast %17 : f32 to vector<256xf32>
    %19 = arith.addf %16, %18 : vector<256xf32>
    %20 = vector.shape_cast %19 : vector<256xf32> to vector<1x1x256xf32>
    %c0_14 = arith.constant 0 : index
    %c0_15 = arith.constant 0 : index
    %c0_16 = arith.constant 0 : index
    %21 = vector.load %arg9[%c0_14, %c0_15, %c0_16] : memref<1x1x256xf32, #tpu.memory_space<vmem>>, vector<1x1x256xf32>
    tpu.vector_store %arg9[%c0_14, %c0_15, %c0_16], %20 {strides = array<i32>} : memref<1x1x256xf32, #tpu.memory_space<vmem>>, vector<1x1x256xf32>,
    %c0_17 = arith.constant 0 : index
    %c0_18 = arith.constant 0 : index
    %22 = vector.load %arg5[%c0_17, %c0_18] : memref<32x8xf32, #tpu.memory_space<vmem>>, vector<32x8xf32>
    %cst_19 = arith.constant dense<0.000000e+00> : vector<1x8xf32>
    %23 = tpu.matmul %7, %22, %cst_19 {dimension_numbers = #tpu.dot_dimension_numbers<[1], [0], [0], [1], [0, 0, 1, 1], [], []>} : vector<1x32xf32>, vector<32x8xf32>, vector<1x8xf32> -> vector<1x8xf32>
    %c0_20 = arith.constant 0 : index
    %c0_21 = arith.constant 0 : index
    %24 = vector.load %arg6[%c0_20, %c0_21] : memref<64x8xf32, #tpu.memory_space<vmem>>, vector<64x8xf32>
    %cst_22 = arith.constant dense<0.000000e+00> : vector<1x8xf32>
    %25 = tpu.matmul %11, %24, %cst_22 {dimension_numbers = #tpu.dot_dimension_numbers<[1], [0], [0], [1], [0, 0, 1, 1], [], []>} : vector<1x64xf32>, vector<64x8xf32>, vector<1x8xf32> -> vector<1x8xf32>
    %26 = arith.addf %23, %25 : vector<1x8xf32>
    %c0_23 = arith.constant 0 : index
    %c0_24 = arith.constant 0 : index
    %27 = vector.load %arg7[%c0_23, %c0_24] : memref<1x8xf32, #tpu.memory_space<vmem>>, vector<1x8xf32>
    %28 = arith.addf %26, %27 : vector<1x8xf32>
    %29 = vector.shape_cast %28 : vector<1x8xf32> to vector<1x1x8xf32>
    %c0_25 = arith.constant 0 : index
    %c0_26 = arith.constant 0 : index
    %c0_27 = arith.constant 0 : index
    %30 = vector.load %arg8[%c0_25, %c0_26, %c0_27] : memref<1x1x8xf32, #tpu.memory_space<vmem>>, vector<1x1x8xf32>
    tpu.vector_store %arg8[%c0_25, %c0_26, %c0_27], %29 {strides = array<i32>} : memref<1x1x8xf32, #tpu.memory_space<vmem>>, vector<1x1x8xf32>,
    return
  }
  func.func @transform_0(%arg0: i32) -> (i32, i32, i32) {
    %c0_i32 = arith.constant 0 : i32
    %c0_i32_0 = arith.constant 0 : i32
    %c0_i32_1 = arith.constant 0 : i32
    return %arg0, %c0_i32, %c0_i32_0 : i32, i32, i32
  }
  func.func @transform_1(%arg0: i32) -> (i32, i32, i32) {
    %c0_i32 = arith.constant 0 : i32
    %c0_i32_0 = arith.constant 0 : i32
    %c0_i32_1 = arith.constant 0 : i32
    return %arg0, %c0_i32, %c0_i32_0 : i32, i32, i32
  }
  func.func @transform_2(%arg0: i32) -> (i32, i32) {
    %c0_i32 = arith.constant 0 : i32
    %c0_i32_0 = arith.constant 0 : i32
    %c0_i32_1 = arith.constant 0 : i32
    return %c0_i32, %c0_i32_0 : i32, i32
  }
  func.func @transform_3(%arg0: i32) -> i32 {
    %c0_i32 = arith.constant 0 : i32
    %c0_i32_0 = arith.constant 0 : i32
    return %c0_i32 : i32
  }
  func.func @transform_4(%arg0: i32) -> (i32, i32) {
    %c0_i32 = arith.constant 0 : i32
    %c0_i32_0 = arith.constant 0 : i32
    %c0_i32_1 = arith.constant 0 : i32
    return %c0_i32, %c0_i32_0 : i32, i32
  }
  func.func @transform_5(%arg0: i32) -> (i32, i32) {
    %c0_i32 = arith.constant 0 : i32
    %c0_i32_0 = arith.constant 0 : i32
    %c0_i32_1 = arith.constant 0 : i32
    return %c0_i32, %c0_i32_0 : i32, i32
  }
  func.func @transform_6(%arg0: i32) -> (i32, i32) {
    %c0_i32 = arith.constant 0 : i32
    %c0_i32_0 = arith.constant 0 : i32
    %c0_i32_1 = arith.constant 0 : i32
    return %c0_i32, %c0_i32_0 : i32, i32
  }
  func.func @transform_7(%arg0: i32) -> (i32, i32, i32) {
    %c0_i32 = arith.constant 0 : i32
    %c0_i32_0 = arith.constant 0 : i32
    %c0_i32_1 = arith.constant 0 : i32
    return %arg0, %c0_i32, %c0_i32_0 : i32, i32, i32
  }
  func.func @transform_8(%arg0: i32) -> (i32, i32, i32) {
    %c0_i32 = arith.constant 0 : i32
    %c0_i32_0 = arith.constant 0 : i32
    %c0_i32_1 = arith.constant 0 : i32
    return %arg0, %c0_i32, %c0_i32_0 : i32, i32, i32
  }
}

</mosaic_0001>

<bundles_post_ra>
// kernel: bothmodels_forward.1
= control target key start
LH: loop header
LB: loop body
LE: loop exit
PB: predicated region body
PF: predicated region fallthrough
CT: control target
= control target key end

     0   :  { %s5523_s0 = inlined_call_operand.vmem [shape: bf16[2,256,32], index: 0, kind: input, shape index: {}]   ;;  %s5524_s1 = inlined_call_operand.vmem [shape: bf16[2,64,64], index: 1, kind: input, shape index: {}]   ;;  %s5525_s2 = inlined_call_operand.vmem [shape: f32[1,32], index: 2, kind: input, shape index: {}]   ;;  %s5526_s3 = inlined_call_operand.<no memory space> [shape: f32[1], index: 3, kind: input, shape index: {}]   ;;  %s5527_s4 = inlined_call_operand.vmem [shape: f32[32,8], index: 4, kind: input, shape index: {}]   ;;  %s5528_s5 = inlined_call_operand.vmem [shape: f32[64,8], index: 5, kind: input, shape index: {}]   ;;  %s5529_s6 = inlined_call_operand.vmem [shape: f32[1,8], index: 6, kind: input, shape index: {}]   ;;  %s5530_s7 = inlined_call_operand.hbm [shape: f32[2,1,8], index: 7, kind: output, shape index: {0}]   ;;  %s5531_s8 = inlined_call_operand.vmem [shape: f32[2,1,256], index: 8, kind: output, shape index: {1}]  }
   0x1   :  { %14 = sst [smem:[#allocation2]] %s5526_s3 }
   0x2   :  { %15 = vsyncpa [#allocation4], 0 }
   0x3   :  { %17 = vsyncpa [#allocation4 + $0x1], 0  ;;  %s4330_s29 = smov 0   ;;  %s4332_s30 = smov 0  }
   0x4   :  { %s4334_s9 = smov 0   ;;  %s4336_s10 = smov 0  }
   0x5 LB: > { %s4351_s3 = sadd.s32 4294967295, %s4273_s10   ;;  %s3989_s11 = sadd.s32 4294967294, %s4273_s10   ;;  %s4273_s10 = sphi %s4336_s10, %s5537_s10   ;;  %s4269_s9 = sphi %s4334_s9, %s5536_s9   ;;  %s4265_s30 = sphi %s4332_s30, %s5535_s30   ;;  %s4261_s29 = sphi %s4330_s29, %s5534_s29  }
   0x6   : > { %s4355_s12 = sadd.s32 1, %s4273_s10   ;;  %s187_s13 = sadd.s32 1, %s4269_s9 }
   0x7   : > { %s184_s14 = ssub.s32 %s4273_s10, %s4355_s12  ;;  %p197_p0 = scmp.ne.s32.totalorder %s4269_s9, %s4265_s30 }
   0x8   : > { %p185_p1 = scmp.eq.s32.totalorder %s184_s14, 0  ;;  %p198_p2 = scmp.eq.s32.totalorder %s4351_s3, 1 }
   0x9   : > { %p203_p3 = scmp.ne.s32.totalorder %s4265_s30, %s4261_s29  ;;  %p204_p4 = scmp.eq.s32.totalorder %s3989_s11, 1 }
   0xa   : > { %s4366_s15 = scalar_select %p185_p1, %s4269_s9, %s187_s13  }
   0xb   : > { %p4368_p5 = por %p198_p2, %p197_p0  ;;  %p4372_p6 = por %p204_p4, %p203_p3 }
   0xc   : > { %p3992_p7 = scmp.ge.s32.totalorder %s4273_s10, 1  ;;  %p279_p8 = scmp.lt.s32.totalorder %s4273_s10, 3 }
   0xe   : > { %p280_p9 = pnand %p3992_p7, %p279_p8 }
   0xf   : > { %p321_p10 = scmp.lt.s32.totalorder (!%p280_p9), %s4351_s3, 1  ;;  %v4275_v0 = vmov (!%p280_p9), 0.0   ;;  %vm4276_vm0 = vmmov (!%p280_p9), 0   ;;  %v4277_v1 = vmov (!%p280_p9), 1065369472   ;;  %vm654_vm1 = vcmask (!%p280_p9), 261120  }
  0x10   : > { %283 = sbr.rel (%p280_p9) target bundleno = 554 (0x22a), region = 48  ;;  %4068 = vmatprep.subr.bf16.mxu1 (!%p280_p9), %v4275_v0  ;;  %4076 = vmatprep.mubr.msk.bf16.mxu1 (!%p280_p9), %vm4276_vm0, %v4275_v0  ;;  %v4409_v6 = vld [vmem:[%s5525_s2] ss:$0 sm:$0xff] (!%p280_p9)  ;;  %vm538_vm2 = vcmask (!%p280_p9), 523264   ;;  %vm3516_vm3 = vcmask (!%p280_p9), 130112   ;;  %vm3523_vm4 = vcmask (!%p280_p9), 195712  }
  0x11   : > { %505 = vmatprep.mubr.bf16.mxu0 (!%p280_p9), %v4277_v1  ;;  %vm3530_vm5 = vcmask (!%p280_p9), 261312   ;;  %vm3537_vm6 = vcmask (!%p280_p9), 326912   ;;  %vm3544_vm7 = vcmask (!%p280_p9), 392512   ;;  %vm3551_vm8 = vcmask (!%p280_p9), 458112  }
  0x12   : > { %vm3558_vm9 = vcmask (!%p280_p9), 523712   ;;  %vm3565_vm10 = vcmask (!%p280_p9), 589312   ;;  %vm3572_vm11 = vcmask (!%p280_p9), 654912   ;;  %vm3579_vm12 = vcmask (!%p280_p9), 720512  }
  0x13   : > { %vm3586_vm13 = vcmask (!%p280_p9), 786112   ;;  %vm3593_vm14 = vcmask (!%p280_p9), 851712   ;;  %vm3600_vm15 = vcmask (!%p280_p9), 917312  }
  0x17   : > { %s4383_s18 = scalar_select %p321_p10, %s4351_s3, 1 }
  0x19   : > { %s4025_s19 = sshll.u32 %s4383_s18, 7  ;;  %s4026_s20 = sshll.u32 %s4383_s18, 5 }
  0x1a   : > { %s4391_s23 = scalar_lea.vmem %s5523_s0, %s4025_s19  ;;  %s4404_s26 = scalar_lea.vmem %s5524_s1, %s4026_s20 }
  0x1b   : > { %v4394_v2 = vld [vmem:[%s4391_s23 + $0x40] sm:$0xff]   ;;  %v4398_v4 = vld [vmem:[%s4391_s23 + $0x48] sm:$0xff]   ;;  %v4412_v9 = vld [vmem:[%s4391_s23 + $0x50] sm:$0xff]   ;;  %s751_s20 = sld [smem:[#allocation2]]  ;;  %s3997_s28 = sshll.u32 %s4383_s18, 1 }
  0x1c   : > { %v337_v3 = vld [vmem:[%s4391_s23] sm:$0xff]   ;;  %v339_v5 = vld [vmem:[%s4391_s23 + $0x8] sm:$0xff]   ;;  %4027 = vmatprep.subr.bf16.mxu0 %v4394_v2  ;;  %v341_v10 = vld [vmem:[%s4391_s23 + $0x10] sm:$0xff]   ;;  %s334_s14 = scalar_lea.vmem %s5531_s8, %s3997_s28  ;;  %s313_s19 = sand.u32 1, %s4265_s30  }
  0x1d   : > { %v584_v7 = vunpack.c.l.bf16 %v337_v3  ;;  %v585_v8 = vunpack.c.h.bf16 %v337_v3  ;;  %4028 = vmatpush3.bf16.msra.mxu0 %v337_v3  ;;  %v4185_v11 = vld [vmem:[%s4404_s26] sm:$0xff]   ;;  %v586_v13 = vunpack.c.l.bf16 %v339_v5  ;;  %v4420_v14 = vld [vmem:[%s4391_s23 + $0x58] sm:$0xff]   ;;  %v587_v16 = vunpack.c.h.bf16 %v339_v5  ;;  %v4188_v17 = vld [vmem:[%s4404_s26 + $0x8] sm:$0xff]   ;;  %s4022_s18 = sshll.u32 %s4351_s3, 4  ;;  %s314_s22 = scalar_lea.vmem [#allocation3], %s313_s19 }
  0x1e   : > { %4029 = vmatprep.subr.bf16.mxu0 %v4398_v4  ;;  %4069 = vmatpush3.bf16.msra.mxu1 %v4185_v11  ;;  %v589_v20 = vunpack.c.h.bf16 %v341_v10  ;;  %v588_v21 = vunpack.c.l.bf16 %v341_v10  ;;  %v343_v22 = vld [vmem:[%s4391_s23 + $0x18] sm:$0xff]   ;;  %v4434_v28 = vld [vmem:[%s4391_s23 + $0x60] sm:$0xff]   ;;  %v4190_v29 = vld [vmem:[%s4404_s26 + $0x10] sm:$0xff]   ;;  %s3879_s27 = scalar_lea.sflag [#allocation4], %s313_s19  ;;  %s4281_s3 = smov [#allocation3]  }
  0x1f   : > { %v622_v12 = vmul.f32 %v4409_v6, %v584_v7  ;;  %v623_v15 = vmul.f32 %v4409_v6, %v585_v8  ;;  %v624_v19 = vmul.f32 %v4409_v6, %v586_v13  ;;  %4070 = vmatprep.subr.bf16.mxu1 %v4275_v0  ;;  %v625_v23 = vmul.f32 %v4409_v6, %v587_v16  ;;  %v345_v32 = vld [vmem:[%s4391_s23 + $0x20] sm:$0xff]   ;;  %v4445_v37 = vld [vmem:[%s4391_s23 + $0x68] sm:$0xff]   ;;  %v4193_v38 = vld [vmem:[%s4404_s26 + $0x18] sm:$0xff]   ;;  %s5481_s26 = scalar_lea.hbm %s5530_s7, %s4022_s18  ;;  %s4215_s11 = sshll.u32 %s4281_s3, 4  ;;  %s4216_s11 = int_to_ptr.vmem [resolvable:$false] %s4215_s11 }
  0x20   : > { %v626_v26 = vmul.f32 %v4409_v6, %v588_v21  ;;  %v590_v27 = vunpack.c.l.bf16 %v343_v22  ;;  %v627_v31 = vmul.f32 %v4409_v6, %v589_v20  ;;  %v591_v33 = vunpack.c.h.bf16 %v343_v22  ;;  %v347_v40 = vld [vmem:[%s4391_s23 + $0x28] sm:$0xff]   ;;  %v4456_v46 = vld [vmem:[%s4391_s23 + $0x70] sm:$0xff]   ;;  %v4467_v54 = vld [vmem:[%s4391_s23 + $0x78] sm:$0xff]   ;;  %s4217_s13 = scalar_lea.vmem %s4216_s11, 32 }
  0x21   : > { %v655_v18 = vsel %vm654_vm1, %v622_v12, 0.0  ;;  %4030 = vmatpush3.bf16.msra.mxu0 %v339_v5  ;;  %v661_v24 = vsel %vm654_vm1, %v624_v19, 0.0  ;;  %v658_v25 = vsel %vm654_vm1, %v623_v15, 0.0  ;;  %v664_v30 = vsel %vm654_vm1, %v625_v23, 0.0  ;;  %v349_v47 = vld [vmem:[%s4391_s23 + $0x30] sm:$0xff]   ;;  %v351_v55 = vld [vmem:[%s4391_s23 + $0x38] sm:$0xff]  }
  0x22   : > { %656 = vadd.xlane.f32.xlu0 %v655_v18  ;;  %4031 = vmatprep.subr.bf16.mxu0 %v4412_v9  ;;  %v667_v34 = vsel %vm654_vm1, %v626_v26, 0.0  ;;  %v628_v35 = vmul.f32 %v4409_v6, %v590_v27  ;;  %v592_v36 = vunpack.c.l.bf16 %v345_v32  ;;  %v670_v39 = vsel %vm654_vm1, %v627_v31, 0.0  ;;  %s3895_s23 = sshll.u32 %s314_s22, 4  ;;  %s5483_s23 = int_to_ptr.vmem [resolvable:$true] %s3895_s23 }
  0x23   : > { %662 = vadd.xlane.f32.xlu1 %v661_v24  ;;  %4071 = vmatpush3.bf16.msra.mxu1 %v4188_v17  ;;  %v629_v41 = vmul.f32 %v4409_v6, %v591_v33  ;;  %v593_v42 = vunpack.c.h.bf16 %v345_v32  ;;  %v594_v45 = vunpack.c.l.bf16 %v347_v40  ;;  %v595_v50 = vunpack.c.h.bf16 %v347_v40  ;;  %s4211_s28 = scalar_lea.vmem %s5483_s23, 16  ;;  %p4218_p0 = scmp.lt.s32.totalorder %s5483_s23, %s4216_s11 }
  0x24   : > { %4072 = vmatprep.subr.bf16.mxu1 %v4275_v0  ;;  %v673_v43 = vsel %vm654_vm1, %v628_v35, 0.0  ;;  %v630_v44 = vmul.f32 %v4409_v6, %v592_v36  ;;  %v596_v53 = vunpack.c.l.bf16 %v349_v47  ;;  %v597_v58 = vunpack.c.h.bf16 %v349_v47  ;;  %p4212_p11 = scmp.ne.s32.totalorder %s5483_s23, %s4211_s28  ;;  %p4219_p1 = scmp.lt.s32.totalorder %s4217_s13, %s4211_s28 }
  0x25   : > { %4032 = vmatpush3.bf16.msra.mxu0 %v341_v10  ;;  %v676_v48 = vsel %vm654_vm1, %v629_v41, 0.0  ;;  %v631_v49 = vmul.f32 %v4409_v6, %v593_v42  ;;  %v632_v52 = vmul.f32 %v4409_v6, %v594_v45  ;;  %v633_v57 = vmul.f32 %v4409_v6, %v595_v50 }
  0x26   : > { %659 = vadd.xlane.f32.xlu0 %v658_v25  ;;  %4033 = vmatprep.subr.bf16.mxu0 %v4420_v14  ;;  %v679_v51 = vsel %vm654_vm1, %v630_v44, 0.0  ;;  %v634_v60 = vmul.f32 %v4409_v6, %v596_v53  ;;  %v598_v61 = vunpack.c.l.bf16 %v351_v55  ;;  %v635_v63 = vmul.f32 %v4409_v6, %v597_v58  ;;  %v3721_v58 = vld [vmem:[%s5528_s5 + $0x8] sm:$0xff]  ;;  %p4213_p12 = pnand %p4212_p11, %p4368_p5  ;;  %p4220_p2 = por %p4219_p1, %p4218_p0 }
  0x27   : > { %665 = vadd.xlane.f32.xlu1 %v664_v30  ;;  %4073 = vmatpush3.bf16.msra.mxu1 %v4190_v29  ;;  %v682_v56 = vsel %vm654_vm1, %v631_v49, 0.0  ;;  %v685_v59 = vsel %vm654_vm1, %v632_v52, 0.0  ;;  %v688_v62 = vsel %vm654_vm1, %v633_v57, 0.0  ;;  %v599_v3 = vunpack.c.h.bf16 %v351_v55 }
  0x28   : > { %4074 = vmatprep.subr.bf16.mxu1 %v4275_v0  ;;  %v600_v5 = vunpack.c.l.bf16 %v4394_v2  ;;  %v691_v7 = vsel %vm654_vm1, %v634_v60, 0.0  ;;  %v636_v8 = vmul.f32 %v4409_v6, %v598_v61  ;;  %v601_v10 = vunpack.c.h.bf16 %v4394_v2  ;;  %p4214_p13 = pneg %p4213_p12 }
  0x29   : > { %4034 = vmatpush3.bf16.msra.mxu0 %v343_v22  ;;  %v694_v11 = vsel %vm654_vm1, %v635_v63, 0.0  ;;  %v637_v12 = vmul.f32 %v4409_v6, %v599_v3  ;;  %v602_v16 = vunpack.c.l.bf16 %v4398_v4  ;;  %v603_v18 = vunpack.c.h.bf16 %v4398_v4  ;;  %v3722_v63 = vld [vmem:[%s5528_s5 + $0x10] sm:$0xff]  ;;  %v3723_v3 = vld [vmem:[%s5528_s5 + $0x18] sm:$0xff] }
  0x2a   : > { %668 = vadd.xlane.f32.xlu0 %v667_v34  ;;  %4035 = vmatprep.subr.bf16.mxu0 %v4434_v28  ;;  %v697_v13 = vsel %vm654_vm1, %v636_v8, 0.0  ;;  %v638_v15 = vmul.f32 %v4409_v6, %v600_v5  ;;  %v639_v2 = vmul.f32 %v4409_v6, %v601_v10  ;;  %v604_v21 = vunpack.c.l.bf16 %v4412_v9  ;;  %p4221_p3 = pnand %p4220_p2, %p4214_p13 }
  0x2b   : > { %671 = vadd.xlane.f32.xlu1 %v670_v39  ;;  %4075 = vmatpush3.bf16.msra.mxu1 %v4193_v38  ;;  %v700_v17 = vsel %vm654_vm1, %v637_v12, 0.0  ;;  %v640_v20 = vmul.f32 %v4409_v6, %v602_v16  ;;  %v4278_v22 = vmov 0   ;;  %v641_v23 = vmul.f32 %v4409_v6, %v603_v18 }
  0x2c   : > { %v703_v19 = vsel %vm654_vm1, %v638_v15, 0.0  ;;  %4174 = vset.pattern.permute.xlu1 %v4278_v22  ;;  %4173 = vset.pattern.permute.xlu0 %v4278_v22  ;;  %v605_v4 = vunpack.c.h.bf16 %v4412_v9  ;;  %v642_v25 = vmul.f32 %v4409_v6, %v604_v21  ;;  %v606_v26 = vunpack.c.l.bf16 %v4420_v14 }
  0x2d   : > { %4036 = vmatpush3.bf16.msra.mxu0 %v345_v32  ;;  %v709_v24 = vsel %vm654_vm1, %v640_v20, 0.0  ;;  %v607_v29 = vunpack.c.h.bf16 %v4420_v14  ;;  %v608_v9 = vunpack.c.l.bf16 %v4434_v28  ;;  %v609_v34 = vunpack.c.h.bf16 %v4434_v28 }
  0x2e   : > { %674 = vadd.xlane.f32.xlu0 %v673_v43  ;;  %4037 = vmatprep.subr.bf16.mxu0 %v4445_v37  ;;  %v643_v27 = vmul.f32 %v4409_v6, %v605_v4  ;;  %v715_v30 = vsel %vm654_vm1, %v642_v25, 0.0  ;;  %v644_v31 = vmul.f32 %v4409_v6, %v606_v26  ;;  %v610_v14 = vunpack.c.l.bf16 %v4445_v37 }
  0x2f   : > { %4077 = vmatmul.mubr.msk.bf16.vlgmr.msra.gmra.mrb[0].mxu1 %vm538_vm2, %v4277_v1  ;;  %677 = vadd.xlane.f32.xlu1 %v676_v48  ;;  %v645_v33 = vmul.f32 %v4409_v6, %v607_v29  ;;  %v646_v36 = vmul.f32 %v4409_v6, %v608_v9  ;;  %v647_v39 = vmul.f32 %v4409_v6, %v609_v34  ;;  %v612_v28 = vunpack.c.l.bf16 %v4456_v46 }
  0x30   : > { %4096 = vmatprep.mubr.msk.f32.mxu1 %vm4276_vm0, %v4275_v0  ;;  %v718_v32 = vsel %vm654_vm1, %v643_v27, 0.0  ;;  %v721_v35 = vsel %vm654_vm1, %v644_v31, 0.0  ;;  %v648_v42 = vmul.f32 %v4409_v6, %v610_v14  ;;  %v613_v45 = vunpack.c.h.bf16 %v4456_v46 }
  0x31   : > { %4038 = vmatpush3.bf16.msra.mxu0 %v347_v40  ;;  %v724_v38 = vsel %vm654_vm1, %v645_v33, 0.0  ;;  %v611_v40 = vunpack.c.h.bf16 %v4445_v37  ;;  %v727_v41 = vsel %vm654_vm1, %v646_v36, 0.0  ;;  %v730_v43 = vsel %vm654_vm1, %v647_v39, 0.0 }
  0x32   : > { %680 = vadd.xlane.f32.xlu0 %v679_v51  ;;  %4039 = vmatprep.subr.bf16.mxu0 %v4456_v46  ;;  %v650_v48 = vmul.f32 %v4409_v6, %v612_v28  ;;  %v614_v37 = vunpack.c.l.bf16 %v4467_v54  ;;  %v651_v50 = vmul.f32 %v4409_v6, %v613_v45  ;;  %v615_v51 = vunpack.c.h.bf16 %v4467_v54 }
  0x33   : > { %683 = vadd.xlane.f32.xlu1 %v682_v56  ;;  %v649_v44 = vmul.f32 %v4409_v6, %v611_v40  ;;  %v4280_v61 = vmov 1966171168   ;;  %v4114_v5 = vpack.c.bf16 %v3723_v3, %v3722_v63  ;;  %v4556_v10 = vstv %s751_s20 }
  0x34   : > { %v739_v52 = vsel %vm654_vm1, %v650_v48, 0.0  ;;  %v652_v53 = vmul.f32 %v4409_v6, %v614_v37  ;;  %v742_v46 = vsel %vm654_vm1, %v651_v50, 0.0 }
  0x35   : > { %4040 = vmatpush3.bf16.msra.mxu0 %v349_v47  ;;  %v733_v47 = vsel %vm654_vm1, %v648_v42, 0.0  ;;  %v736_v49 = vsel %vm654_vm1, %v649_v44, 0.0 }
  0x36   : > { %686 = vadd.xlane.f32.xlu0 %v685_v59  ;;  %4041 = vmatprep.subr.bf16.mxu0 %v4467_v54  ;;  %v745_v56 = vsel %vm654_vm1, %v652_v53, 0.0  ;;  %v3720_v54 = vld [vmem:[%s5528_s5] sm:$0xff]  ;;  %v4279_v59 = vmov 0.0|0.0  }
  0x37   : > { %689 = vadd.xlane.f32.xlu1 %v688_v62  ;;  %4110 = vmatprep.subr.bf16.mxu1 %v4279_v59  ;;  %v4111_v60 = vpack.c.bf16 %v3721_v58, %v3720_v54  ;;  %v1846_v62 = vunpack.c.l.s4 %v4280_v61 }
  0x39   : > { %4042 = vmatpush3.bf16.msra.mxu0 %v351_v55  ;;  %v653_v55 = vmul.f32 %v4409_v6, %v615_v51  ;;  %4112 = vmatpush3.bf16.msra.mxu1 %v4111_v60  ;;  %v817_v6 = vlaneseq  ;;  %v1847_v8 = vunpack.c.0.s8 %v1846_v62 }
  0x3a   : > { %692 = vadd.xlane.f32.xlu0 %v691_v7  ;;  %4122 = vmatprep.subr.bf16.mxu0 %v4279_v59 }
  0x3b   : > { %695 = vadd.xlane.f32.xlu1 %v694_v11  ;;  %v748_v57 = vsel %vm654_vm1, %v653_v55, 0.0  ;;  %4113 = vmatprep.subr.bf16.mxu1 %v4279_v59  ;;  %v4553_v7 = vshrl.u32 %v817_v6, 7 }
  0x3c   : > { %506 = vmatmul.mubr.bf16.vlgmr.msra.gmra.mrb[0].mxu0 %v4277_v1  ;;  %v706_v1 = vsel %vm654_vm1, %v639_v2, 0.0 }
  0x3d   : > { %4107 = vmatprep.mubr.msk.f32.mxu0 %vm4276_vm0, %v4275_v0  ;;  %v712_v0 = vsel %vm654_vm1, %v641_v23, 0.0  ;;  %4115 = vmatpush3.bf16.msra.mxu1 %v4114_v5  ;;  %v4559_v12 = vsub.s32 0, %v4553_v7  ;;  %v4568_v16 = vsub.s32 2, %v4553_v7  ;;  %v4574_v2 = vsub.s32 4, %v4553_v7 }
  0x3e   : > { %698 = vadd.xlane.f32.xlu0 %v697_v13  ;;  %4116 = vmatprep.subr.bf16.mxu1 %v4279_v59  ;;  %v4562_v13 = vsub.s32 1, %v4553_v7  ;;  %v4580_v20 = vsub.s32 6, %v4553_v7  ;;  %v4583_v21 = vsub.s32 7, %v4553_v7  ;;  %v4586_v22 = vsub.s32 %v1847_v8, %v4553_v7 }
  0x3f   : > { %701 = vadd.xlane.f32.xlu1 %v700_v17  ;;  %v4571_v17 = vsub.s32 3, %v4553_v7  ;;  %vm3607_vm0 = vcmask 982912  }
  0x42   : > { %704 = vadd.xlane.f32.xlu0 %v703_v19  ;;  %v4577_v19 = vsub.s32 5, %v4553_v7 }
  0x43   : > { %707 = vadd.xlane.f32.xlu1 %v706_v1 }
  0x46   : > { %710 = vadd.xlane.f32.xlu0 %v709_v24 }
  0x47   : > { %713 = vadd.xlane.f32.xlu1 %v712_v0 }
  0x4a   : > { %716 = vadd.xlane.f32.xlu0 %v715_v30 }
  0x4b   : > { %719 = vadd.xlane.f32.xlu1 %v718_v32 }
  0x4e   : > { %722 = vadd.xlane.f32.xlu0 %v721_v35 }
  0x4f   : > { %725 = vadd.xlane.f32.xlu1 %v724_v38 }
  0x52   : > { %728 = vadd.xlane.f32.xlu0 %v727_v41 }
  0x53   : > { %731 = vadd.xlane.f32.xlu1 %v730_v43 }
  0x56   : > { %734 = vadd.xlane.f32.xlu0 %v733_v47 }
  0x57   : > { %737 = vadd.xlane.f32.xlu1 %v736_v49 }
  0x5a   : > { %740 = vadd.xlane.f32.xlu0 %v739_v52 }
  0x5b   : > { %743 = vadd.xlane.f32.xlu1 %v742_v46 }
  0x5e   : > { %746 = vadd.xlane.f32.xlu0 %v745_v56 }
  0x5f   : > { %749 = vadd.xlane.f32.xlu1 %v748_v57 }
  0xaf   : > { %v657_v11 = vpop.xlane.xlu0 %656 }
  0xb0   : > { %v4565_v15 = vadd.f32 %v4556_v10, %v657_v11  ;;  %v663_v18 = vpop.xlane.xlu1 %662 }
  0xb1   : > { %v755_v1 = vadd.f32 %v4556_v10, %v663_v18 }
  0xb2   : > { %v820_v23 = vrot.slane %v4565_v15, %v4559_v12  ;;  %v824_v4 = vrot.slane %v4565_v15, %v4562_v13  ;;  %v828_v24 = vrot.slane %v4565_v15, %v4568_v16  ;;  %v832_v26 = vrot.slane %v4565_v15, %v4571_v17 }
  0xb3   : > { %v660_v25 = vpop.xlane.xlu0 %659  ;;  %v836_v0 = vrot.slane %v4565_v15, %v4574_v2  ;;  %v840_v27 = vrot.slane %v4565_v15, %v4577_v19  ;;  %v844_v29 = vrot.slane %v4565_v15, %v4580_v20  ;;  %v884_v31 = vrot.slane %v755_v1, %v4559_v12 }
  0xb4   : > { %v754_v30 = vadd.f32 %v4556_v10, %v660_v25  ;;  %v888_v9 = vrot.slane %v755_v1, %v4562_v13  ;;  %v892_v32 = vrot.slane %v755_v1, %v4568_v16  ;;  %v666_v33 = vpop.xlane.xlu1 %665  ;;  %v896_v34 = vrot.slane %v755_v1, %v4571_v17 }
  0xb5   : > { %v900_v35 = vrot.slane %v755_v1, %v4574_v2  ;;  %v904_v36 = vrot.slane %v755_v1, %v4577_v19  ;;  %v908_v14 = vrot.slane %v755_v1, %v4580_v20  ;;  %v756_v38 = vadd.f32 %v4556_v10, %v666_v33 }
  0xb6   : > { %v852_v39 = vrot.slane %v754_v30, %v4559_v12  ;;  %v856_v40 = vrot.slane %v754_v30, %v4562_v13  ;;  %v860_v41 = vrot.slane %v754_v30, %v4568_v16  ;;  %v864_v28 = vrot.slane %v754_v30, %v4571_v17 }
  0xb7   : > { %v669_v42 = vpop.xlane.xlu0 %668  ;;  %v868_v43 = vrot.slane %v754_v30, %v4574_v2  ;;  %v872_v44 = vrot.slane %v754_v30, %v4577_v19  ;;  %v876_v45 = vrot.slane %v754_v30, %v4580_v20  ;;  %v880_v48 = vrot.slane %v754_v30, %v4583_v21 }
  0xb8   : > { %v4620_v47 = vadd.f32 %v4556_v10, %v669_v42  ;;  %v1890_v37 = vcombine.low %v852_v39, %v856_v40  ;;  %v912_v49 = vrot.slane %v755_v1, %v4583_v21  ;;  %v672_v50 = vpop.xlane.xlu1 %671  ;;  %v1891_v51 = vcombine.low %v860_v41, %v864_v28 }
  0xb9   : > { %v1892_v52 = vcombine.low %v868_v43, %v872_v44  ;;  %v1939_v53 = vcombine.low %v884_v31, %v888_v9  ;;  %v1940_v46 = vcombine.low %v892_v32, %v896_v34  ;;  %v4625_v55 = vadd.f32 %v4556_v10, %v672_v50 }
  0xba   : > { %v1893_v56 = vcombine.low %v876_v45, %v880_v48  ;;  %v1900_v57 = vrot.slane %v1890_v37, %v4586_v22  ;;  %v1941_v54 = vcombine.low %v900_v35, %v904_v36  ;;  %v1907_v60 = vrot.slane %v1891_v51, %v4586_v22 }
  0xbb   : > { %v675_v58 = vpop.xlane.xlu0 %674  ;;  %v1914_v61 = vrot.slane %v1892_v52, %v4586_v22  ;;  %v1942_v62 = vcombine.low %v908_v14, %v912_v49  ;;  %v1949_v63 = vrot.slane %v1939_v53, %v4586_v22  ;;  %v1956_v8 = vrot.slane %v1940_v46, %v4586_v22 }
  0xbc   : > { %v4632_v3 = vadd.f32 %v4556_v10, %v675_v58  ;;  %v1921_v5 = vrot.slane %v1893_v56, %v4586_v22  ;;  %v1963_v11 = vrot.slane %v1941_v54, %v4586_v22  ;;  %v1922_v18 = vcombine.low %v1900_v57, %v1907_v60  ;;  %v678_v31 = vpop.xlane.xlu1 %677 }
  0xbd   : > { %v1970_v1 = vrot.slane %v1942_v62, %v4586_v22  ;;  %v916_v25 = vrot.slane %v756_v38, %v4559_v12  ;;  %v920_v30 = vrot.slane %v756_v38, %v4562_v13  ;;  %v1971_v32 = vcombine.low %v1949_v63, %v1956_v8 }
  0xbe   : > { %v1923_v9 = vcombine.low %v1914_v61, %v1921_v5  ;;  %v924_v33 = vrot.slane %v756_v38, %v4568_v16  ;;  %v928_v34 = vrot.slane %v756_v38, %v4571_v17  ;;  %v4643_v35 = vadd.f32 %v4556_v10, %v678_v31 }
  0xbf   : > { %v1930_v36 = vrot.slane %v1922_v18, %v4586_v22  ;;  %v681_v14 = vpop.xlane.xlu0 %680  ;;  %v1972_v39 = vcombine.low %v1963_v11, %v1970_v1  ;;  %v932_v40 = vrot.slane %v756_v38, %v4574_v2  ;;  %v1979_v28 = vrot.slane %v1971_v32, %v4586_v22 }
  0xc0   : > { %v1937_v41 = vrot.slane %v1923_v9, %v4586_v22  ;;  %v4649_v42 = vadd.f32 %v4556_v10, %v681_v14  ;;  %v936_v43 = vrot.slane %v756_v38, %v4577_v19  ;;  %v940_v45 = vrot.slane %v756_v38, %v4580_v20  ;;  %v684_v50 = vpop.xlane.xlu1 %683 }
  0xc1   : > { %v1986_v44 = vrot.slane %v1972_v39, %v4586_v22  ;;  %v944_v48 = vrot.slane %v756_v38, %v4583_v21  ;;  %v1988_v37 = vcombine.low %v916_v25, %v920_v30  ;;  %v1989_v51 = vcombine.low %v924_v33, %v928_v34 }
  0xc2   : > { %v1938_v49 = vcombine.low %v1930_v36, %v1937_v41  ;;  %v1990_v52 = vcombine.low %v932_v40, %v936_v43  ;;  %v948_v53 = vrot.slane %v4620_v47, %v4559_v12  ;;  %v4659_v46 = vadd.f32 %v4556_v10, %v684_v50 }
  0xc3   : > { %v1987_v56 = vcombine.low %v1979_v28, %v1986_v44  ;;  %v687_v57 = vpop.xlane.xlu0 %686  ;;  %v1991_v54 = vcombine.low %v940_v45, %v944_v48  ;;  %v1998_v58 = vrot.slane %v1988_v37, %v4586_v22  ;;  %v2005_v38 = vrot.slane %v1989_v51, %v4586_v22 }
  0xc4   : > { %3413 = vperm.xlu1 %4174, %v1938_v49   ;;  %v4663_v60 = vadd.f32 %v4556_v10, %v687_v57  ;;  %v2012_v61 = vrot.slane %v1990_v52, %v4586_v22  ;;  %v952_v62 = vrot.slane %v4620_v47, %v4562_v13  ;;  %v956_v5 = vrot.slane %v4620_v47, %v4568_v16  ;;  %v690_v18 = vpop.xlane.xlu1 %689 }
  0xc5   : > { %v2019_v63 = vrot.slane %v1991_v54, %v4586_v22  ;;  %v960_v8 = vrot.slane %v4620_v47, %v4571_v17  ;;  %v964_v11 = vrot.slane %v4620_v47, %v4574_v2  ;;  %v2020_v1 = vcombine.low %v1998_v58, %v2005_v38 }
  0xc6   : > { %v968_v25 = vrot.slane %v4620_v47, %v4577_v19  ;;  %v972_v30 = vrot.slane %v4620_v47, %v4580_v20  ;;  %v976_v31 = vrot.slane %v4620_v47, %v4583_v21  ;;  %v4683_v9 = vadd.f32 %v4556_v10, %v690_v18 }
  0xc7   : > { %v2021_v32 = vcombine.low %v2012_v61, %v2019_v63  ;;  %v693_v33 = vpop.xlane.xlu0 %692  ;;  %v2037_v34 = vcombine.low %v948_v53, %v952_v62  ;;  %v2038_v36 = vcombine.low %v956_v5, %v960_v8  ;;  %v2028_v14 = vrot.slane %v2020_v1, %v4586_v22 }
  0xc8   : > { %3416 = vperm.xlu1 %4174, %v1987_v56   ;;  %v4687_v39 = vadd.f32 %v4556_v10, %v693_v33  ;;  %v2039_v40 = vcombine.low %v964_v11, %v968_v25  ;;  %v2040_v41 = vcombine.low %v972_v30, %v976_v31  ;;  %v980_v44 = vrot.slane %v4625_v55, %v4559_v12  ;;  %v696_v45 = vpop.xlane.xlu1 %695 }
  0xc9   : > { %v2035_v28 = vrot.slane %v2021_v32, %v4586_v22  ;;  %v2047_v43 = vrot.slane %v2037_v34, %v4586_v22  ;;  %v2054_v47 = vrot.slane %v2038_v36, %v4586_v22  ;;  %v984_v49 = vrot.slane %v4625_v55, %v4562_v13 }
  0xca   : > { %v2061_v48 = vrot.slane %v2039_v40, %v4586_v22  ;;  %v2068_v37 = vrot.slane %v2040_v41, %v4586_v22  ;;  %v988_v50 = vrot.slane %v4625_v55, %v4568_v16  ;;  %v4701_v52 = vadd.f32 %v4556_v10, %v696_v45 }
  0xcb   : > { %v2036_v51 = vcombine.low %v2028_v14, %v2035_v28  ;;  %v2069_v53 = vcombine.low %v2047_v43, %v2054_v47  ;;  %v699_v56 = vpop.xlane.xlu0 %698  ;;  %v992_v57 = vrot.slane %v4625_v55, %v4571_v17  ;;  %v996_v38 = vrot.slane %v4625_v55, %v4574_v2 }
  0xcc   : > { %v2070_v54 = vcombine.low %v2061_v48, %v2068_v37  ;;  %v4706_v58 = vadd.f32 %v4556_v10, %v699_v56  ;;  %v1000_v61 = vrot.slane %v4625_v55, %v4577_v19  ;;  %v1004_v63 = vrot.slane %v4625_v55, %v4580_v20  ;;  %v702_v18 = vpop.xlane.xlu1 %701 }
  0xcd   : > { %3419 = vperm.xlu1 %4174, %v2036_v51   ;;  %v2077_v62 = vrot.slane %v2069_v53, %v4586_v22  ;;  %v1008_v5 = vrot.slane %v4625_v55, %v4583_v21  ;;  %v2086_v8 = vcombine.low %v980_v44, %v984_v49  ;;  %v2087_v1 = vcombine.low %v988_v50, %v992_v57 }
  0xce   : > { %v2084_v11 = vrot.slane %v2070_v54, %v4586_v22  ;;  %v2088_v25 = vcombine.low %v996_v38, %v1000_v61  ;;  %v1012_v30 = vrot.slane %v4632_v3, %v4559_v12  ;;  %v4721_v31 = vadd.f32 %v4556_v10, %v702_v18 }
  0xcf   : > { %v2089_v32 = vcombine.low %v1004_v63, %v1008_v5  ;;  %v2096_v33 = vrot.slane %v2086_v8, %v4586_v22  ;;  %v705_v34 = vpop.xlane.xlu0 %704  ;;  %v1016_v36 = vrot.slane %v4632_v3, %v4562_v13  ;;  %v2103_v14 = vrot.slane %v2087_v1, %v4586_v22 }
  0xd0   : > { %v2085_v55 = vcombine.low %v2077_v62, %v2084_v11  ;;  %v2110_v40 = vrot.slane %v2088_v25, %v4586_v22  ;;  %v4729_v41 = vadd.f32 %v4556_v10, %v705_v34  ;;  %v1020_v43 = vrot.slane %v4632_v3, %v4568_v16  ;;  %v708_v48 = vpop.xlane.xlu1 %707 }
  0xd1   : > { %v2117_v28 = vrot.slane %v2089_v32, %v4586_v22  ;;  %v1024_v47 = vrot.slane %v4632_v3, %v4571_v17  ;;  %v1028_v44 = vrot.slane %v4632_v3, %v4574_v2  ;;  %v2118_v45 = vcombine.low %v2096_v33, %v2103_v14 }
  0xd2   : > { %3422 = vperm.xlu1 %4174, %v2085_v55   ;;  %v1032_v37 = vrot.slane %v4632_v3, %v4577_v19  ;;  %v1036_v49 = vrot.slane %v4632_v3, %v4580_v20  ;;  %v1040_v50 = vrot.slane %v4632_v3, %v4583_v21  ;;  %v4745_v53 = vadd.f32 %v4556_v10, %v708_v48 }
  0xd3   : > { %v2119_v51 = vcombine.low %v2110_v40, %v2117_v28  ;;  %v2135_v56 = vcombine.low %v1012_v30, %v1016_v36  ;;  %v2136_v57 = vcombine.low %v1020_v43, %v1024_v47  ;;  %v711_v54 = vpop.xlane.xlu0 %710  ;;  %v2126_v38 = vrot.slane %v2118_v45, %v4586_v22 }
  0xd4   : > { %v2137_v61 = vcombine.low %v1028_v44, %v1032_v37  ;;  %v2138_v62 = vcombine.low %v1036_v49, %v1040_v50  ;;  %v4749_v63 = vadd.f32 %v4556_v10, %v711_v54  ;;  %v848_v11 = vrot.slane %v4565_v15, %v4583_v21  ;;  %v714_v25 = vpop.xlane.xlu1 %713 }
  0xd5   : > { %v2133_v5 = vrot.slane %v2119_v51, %v4586_v22  ;;  %v2145_v8 = vrot.slane %v2135_v56, %v4586_v22  ;;  %v2152_v3 = vrot.slane %v2136_v57, %v4586_v22  ;;  %v1841_v30 = vcombine.low %v820_v23, %v824_v4 }
  0xd6   : > { %v2159_v18 = vrot.slane %v2137_v61, %v4586_v22  ;;  %v2166_v1 = vrot.slane %v2138_v62, %v4586_v22  ;;  %v1842_v32 = vcombine.low %v828_v24, %v832_v26  ;;  %v4771_v36 = vadd.f32 %v4556_v10, %v714_v25 }
  0xd7   : > { %v2134_v33 = vcombine.low %v2126_v38, %v2133_v5  ;;  %v2167_v34 = vcombine.low %v2145_v8, %v2152_v3  ;;  %v1843_v55 = vcombine.low %v836_v0, %v840_v27  ;;  %v1844_v4 = vcombine.low %v844_v29, %v848_v11  ;;  %v717_v49 = vpop.xlane.xlu0 %716 }
  0xd8   : > { %v2168_v23 = vcombine.low %v2159_v18, %v2166_v1  ;;  %v1851_v14 = vrot.slane %v1841_v30, %v4586_v22  ;;  %v1858_v24 = vrot.slane %v1842_v32, %v4586_v22  ;;  %v1044_v28 = vrot.slane %v4643_v35, %v4559_v12  ;;  %v720_v47 = vpop.xlane.xlu1 %719 }
  0xd9   : > { %3425 = vperm.xlu1 %4174, %v2134_v33   ;;  %v2175_v26 = vrot.slane %v2167_v34, %v4586_v22  ;;  %v1865_v40 = vrot.slane %v1843_v55, %v4586_v22  ;;  %v1048_v0 = vrot.slane %v4643_v35, %v4562_v13  ;;  %v1872_v15 = vrot.slane %v1844_v4, %v4586_v22 }
  0xda   : > { %v2182_v27 = vrot.slane %v2168_v23, %v4586_v22  ;;  %v1873_v29 = vcombine.low %v1851_v14, %v1858_v24  ;;  %v1052_v43 = vrot.slane %v4643_v35, %v4568_v16  ;;  %v1056_v44 = vrot.slane %v4643_v35, %v4571_v17 }
  0xdb   : > { %v1060_v45 = vrot.slane %v4643_v35, %v4574_v2  ;;  %v1064_v48 = vrot.slane %v4643_v35, %v4577_v19  ;;  %v1068_v37 = vrot.slane %v4643_v35, %v4580_v20  ;;  %v1874_v51 = vcombine.low %v1865_v40, %v1872_v15 }
  0xdc   : > { %v2183_v50 = vcombine.low %v2175_v26, %v2182_v27  ;;  %v1881_v56 = vrot.slane %v1873_v29, %v4586_v22  ;;  %v1072_v57 = vrot.slane %v4643_v35, %v4583_v21  ;;  %v2184_v54 = vcombine.low %v1044_v28, %v1048_v0 }
  0xdd   : > { %v2185_v38 = vcombine.low %v1052_v43, %v1056_v44  ;;  %v2186_v61 = vcombine.low %v1060_v45, %v1064_v48  ;;  %v4806_v62 = vadd.f32 %v4556_v10, %v720_v47  ;;  %v1888_v5 = vrot.slane %v1874_v51, %v4586_v22 }
  0xde   : > { %3428 = vperm.xlu1 %4174, %v2183_v50   ;;  %v2187_v8 = vcombine.low %v1068_v37, %v1072_v57  ;;  %v4810_v3 = vadd.f32 %v4556_v10, %v717_v49  ;;  %v1108_v11 = vrot.slane %v4659_v46, %v4559_v12  ;;  %v2194_v18 = vrot.slane %v2184_v54, %v4586_v22  ;;  %v726_v50 = vpop.xlane.xlu1 %725 }
  0xdf   : > { %v2201_v35 = vrot.slane %v2185_v38, %v4586_v22  ;;  %v2208_v1 = vrot.slane %v2186_v61, %v4586_v22  ;;  %v1112_v25 = vrot.slane %v4659_v46, %v4562_v13  ;;  %v1889_v30 = vcombine.low %v1881_v56, %v1888_v5  ;;  %v723_v38 = vpop.xlane.xlu0 %722 }
  0xe0   : > { %v2215_v32 = vrot.slane %v2187_v8, %v4586_v22  ;;  %v1116_v33 = vrot.slane %v4659_v46, %v4568_v16  ;;  %v1120_v34 = vrot.slane %v4659_v46, %v4571_v17  ;;  %v1124_v23 = vrot.slane %v4659_v46, %v4574_v2 }
  0xe1   : > { %v2216_v55 = vcombine.low %v2194_v18, %v2201_v35  ;;  %v1128_v4 = vrot.slane %v4659_v46, %v4577_v19  ;;  %v1132_v14 = vrot.slane %v4659_v46, %v4580_v20  ;;  %3410 = vperm.xlu0 %4173, %v1889_v30   ;;  %v1136_v26 = vrot.slane %v4659_v46, %v4583_v21 }
  0xe2   : > { %v2217_v24 = vcombine.low %v2208_v1, %v2215_v32  ;;  %v2282_v40 = vcombine.low %v1108_v11, %v1112_v25  ;;  %v2283_v28 = vcombine.low %v1116_v33, %v1120_v34  ;;  %v1076_v15 = vrot.slane %v4649_v42, %v4559_v12 }
  0xe3   : > { %v2224_v0 = vrot.slane %v2216_v55, %v4586_v22  ;;  %v2284_v27 = vcombine.low %v1124_v23, %v1128_v4  ;;  %v1080_v29 = vrot.slane %v4649_v42, %v4562_v13  ;;  %v2285_v47 = vcombine.low %v1132_v14, %v1136_v26 }
  0xe4   : > { %v2231_v43 = vrot.slane %v2217_v24, %v4586_v22  ;;  %v2292_v44 = vrot.slane %v2282_v40, %v4586_v22  ;;  %v2299_v45 = vrot.slane %v2283_v28, %v4586_v22  ;;  %v1084_v48 = vrot.slane %v4649_v42, %v4568_v16 }
  0xe5   : > { %v2306_v46 = vrot.slane %v2284_v27, %v4586_v22  ;;  %v1088_v37 = vrot.slane %v4649_v42, %v4571_v17  ;;  %v1092_v49 = vrot.slane %v4649_v42, %v4574_v2  ;;  %v2313_v56 = vrot.slane %v2285_v47, %v4586_v22 }
  0xe6   : > { %v2232_v51 = vcombine.low %v2224_v0, %v2231_v43  ;;  %v2314_v57 = vcombine.low %v2292_v44, %v2299_v45  ;;  %v1096_v54 = vrot.slane %v4649_v42, %v4577_v19  ;;  %v1100_v61 = vrot.slane %v4649_v42, %v4580_v20 }
  0xe7   : > { %v1104_v5 = vrot.slane %v4649_v42, %v4583_v21  ;;  %v2233_v8 = vcombine.low %v1076_v15, %v1080_v29  ;;  %v2234_v11 = vcombine.low %v1084_v48, %v1088_v37  ;;  %v2315_v18 = vcombine.low %v2306_v46, %v2313_v56 }
  0xe8   : > { %3431 = vperm.xlu1 %4174, %v2232_v51   ;;  %v2322_v35 = vrot.slane %v2314_v57, %v4586_v22  ;;  %v2235_v1 = vcombine.low %v1092_v49, %v1096_v54  ;;  %v4856_v25 = vadd.f32 %v4556_v10, %v726_v50  ;;  %v4861_v34 = vadd.f32 %v4556_v10, %v723_v38 }
  0xe9   : > { %v2236_v30 = vcombine.low %v1100_v61, %v1104_v5  ;;  %v2243_v32 = vrot.slane %v2233_v8, %v4586_v22  ;;  %v2250_v33 = vrot.slane %v2234_v11, %v4586_v22  ;;  %v2329_v42 = vrot.slane %v2315_v18, %v4586_v22  ;;  %v732_v61 = vpop.xlane.xlu1 %731  ;;  %v729_v5 = vpop.xlane.xlu0 %728 }
  0xea   : > { %v2257_v55 = vrot.slane %v2235_v1, %v4586_v22  ;;  %v1364_v23 = vrot.slane %v4745_v53, %v4559_v12  ;;  %v1368_v4 = vrot.slane %v4745_v53, %v4562_v13  ;;  %v1372_v26 = vrot.slane %v4745_v53, %v4568_v16 }
  0xeb   : > { %v2264_v14 = vrot.slane %v2236_v30, %v4586_v22  ;;  %v2265_v24 = vcombine.low %v2243_v32, %v2250_v33  ;;  %v1376_v40 = vrot.slane %v4745_v53, %v4571_v17  ;;  %v2330_v28 = vcombine.low %v2322_v35, %v2329_v42 }
  0xec   : > { %v1380_v0 = vrot.slane %v4745_v53, %v4574_v2  ;;  %v1384_v27 = vrot.slane %v4745_v53, %v4577_v19  ;;  %v1388_v15 = vrot.slane %v4745_v53, %v4580_v20  ;;  %v1392_v47 = vrot.slane %v4745_v53, %v4583_v21 }
  0xed   : > { %v2266_v29 = vcombine.low %v2257_v55, %v2264_v14  ;;  %v2273_v43 = vrot.slane %v2265_v24, %v4586_v22  ;;  %v2674_v44 = vcombine.low %v1364_v23, %v1368_v4  ;;  %3437 = vperm.xlu0 %4173, %v2330_v28   ;;  %v2675_v45 = vcombine.low %v1372_v26, %v1376_v40 }
  0xee   : > { %v2676_v46 = vcombine.low %v1380_v0, %v1384_v27  ;;  %v1332_v48 = vrot.slane %v4729_v41, %v4559_v12  ;;  %v1336_v37 = vrot.slane %v4729_v41, %v4562_v13  ;;  %v2677_v50 = vcombine.low %v1388_v15, %v1392_v47 }
  0xef   : > { %v2280_v49 = vrot.slane %v2266_v29, %v4586_v22  ;;  %v2684_v51 = vrot.slane %v2674_v44, %v4586_v22  ;;  %v1340_v56 = vrot.slane %v4729_v41, %v4568_v16  ;;  %v2691_v53 = vrot.slane %v2675_v45, %v4586_v22 }
  0xf0   : > { %v2698_v57 = vrot.slane %v2676_v46, %v4586_v22  ;;  %v1344_v54 = vrot.slane %v4729_v41, %v4571_v17  ;;  %v1348_v38 = vrot.slane %v4729_v41, %v4574_v2  ;;  %v2705_v11 = vrot.slane %v2677_v50, %v4586_v22 }
  0xf1   : > { %v2281_v8 = vcombine.low %v2273_v43, %v2280_v49  ;;  %v1352_v18 = vrot.slane %v4729_v41, %v4577_v19  ;;  %v1356_v35 = vrot.slane %v4729_v41, %v4580_v20  ;;  %v2706_v1 = vcombine.low %v2684_v51, %v2691_v53 }
  0xf2   : > { %v1360_v30 = vrot.slane %v4729_v41, %v4583_v21  ;;  %v2625_v32 = vcombine.low %v1332_v48, %v1336_v37  ;;  %v2626_v33 = vcombine.low %v1340_v56, %v1344_v54  ;;  %v2707_v42 = vcombine.low %v2698_v57, %v2705_v11 }
  0xf3   : > { %3434 = vperm.xlu1 %4174, %v2281_v8   ;;  %v2627_v55 = vcombine.low %v1348_v38, %v1352_v18  ;;  %v4905_v23 = vadd.f32 %v4556_v10, %v732_v61  ;;  %v4908_v4 = vadd.f32 %v4556_v10, %v729_v5  ;;  %v2714_v14 = vrot.slane %v2706_v1, %v4586_v22  ;;  %v735_v1 = vpop.xlane.xlu0 %734 }
  0xf4   : > { %v2628_v24 = vcombine.low %v1356_v35, %v1360_v30  ;;  %v2635_v26 = vrot.slane %v2625_v32, %v4586_v22  ;;  %v2642_v40 = vrot.slane %v2626_v33, %v4586_v22  ;;  %v2721_v41 = vrot.slane %v2707_v42, %v4586_v22 }
  0xf5   : > { %v2649_v28 = vrot.slane %v2627_v55, %v4586_v22  ;;  %v1428_v0 = vrot.slane %v4771_v36, %v4559_v12  ;;  %v1432_v27 = vrot.slane %v4771_v36, %v4562_v13  ;;  %v1436_v43 = vrot.slane %v4771_v36, %v4568_v16 }
  0xf6   : > { %v2656_v15 = vrot.slane %v2628_v24, %v4586_v22  ;;  %v2657_v29 = vcombine.low %v2635_v26, %v2642_v40  ;;  %v1440_v47 = vrot.slane %v4771_v36, %v4571_v17  ;;  %v2722_v44 = vcombine.low %v2714_v14, %v2721_v41 }
  0xf7   : > { %v1444_v45 = vrot.slane %v4771_v36, %v4574_v2  ;;  %v1448_v46 = vrot.slane %v4771_v36, %v4577_v19  ;;  %v1452_v48 = vrot.slane %v4771_v36, %v4580_v20  ;;  %v1456_v50 = vrot.slane %v4771_v36, %v4583_v21 }
  0xf8   : > { %v2658_v37 = vcombine.low %v2649_v28, %v2656_v15  ;;  %v2665_v49 = vrot.slane %v2657_v29, %v4586_v22  ;;  %v2772_v51 = vcombine.low %v1428_v0, %v1432_v27  ;;  %3461 = vperm.xlu0 %4173, %v2722_v44   ;;  %v2773_v56 = vcombine.low %v1436_v43, %v1440_v47 }
  0xf9   : > { %v2774_v53 = vcombine.low %v1444_v45, %v1448_v46  ;;  %v1396_v57 = vrot.slane %v4749_v63, %v4559_v12  ;;  %v1400_v54 = vrot.slane %v4749_v63, %v4562_v13  ;;  %v2775_v61 = vcombine.low %v1452_v48, %v1456_v50 }
  0xfa   : > { %v2672_v38 = vrot.slane %v2658_v37, %v4586_v22  ;;  %v2782_v5 = vrot.slane %v2772_v51, %v4586_v22  ;;  %v1404_v8 = vrot.slane %v4749_v63, %v4568_v16  ;;  %v2789_v36 = vrot.slane %v2773_v56, %v4586_v22 }
  0xfb   : > { %v2796_v11 = vrot.slane %v2774_v53, %v4586_v22  ;;  %v1408_v18 = vrot.slane %v4749_v63, %v4571_v17  ;;  %v1412_v35 = vrot.slane %v4749_v63, %v4574_v2  ;;  %v2803_v32 = vrot.slane %v2775_v61, %v4586_v22 }
  0xfc   : > { %v2673_v30 = vcombine.low %v2665_v49, %v2672_v38  ;;  %v1416_v33 = vrot.slane %v4749_v63, %v4577_v19  ;;  %v1420_v42 = vrot.slane %v4749_v63, %v4580_v20  ;;  %v2804_v55 = vcombine.low %v2782_v5, %v2789_v36 }
  0xfd   : > { %v1424_v14 = vrot.slane %v4749_v63, %v4583_v21  ;;  %v2723_v24 = vcombine.low %v1396_v57, %v1400_v54  ;;  %v2724_v26 = vcombine.low %v1404_v8, %v1408_v18  ;;  %v2805_v40 = vcombine.low %v2796_v11, %v2803_v32 }
  0xfe   : > { %3458 = vperm.xlu1 %4174, %v2673_v30   ;;  %v2725_v41 = vcombine.low %v1412_v35, %v1416_v33  ;;  %v4955_v28 = vadd.f32 %v4556_v10, %v735_v1  ;;  %v1492_v0 = vrot.slane %v4806_v62, %v4559_v12  ;;  %v2812_v27 = vrot.slane %v2804_v55, %v4586_v22 }
  0xff   : > { %v2726_v15 = vcombine.low %v1420_v42, %v1424_v14  ;;  %v2733_v29 = vrot.slane %v2723_v24, %v4586_v22  ;;  %v2740_v43 = vrot.slane %v2724_v26, %v4586_v22  ;;  %v2819_v63 = vrot.slane %v2805_v40, %v4586_v22  ;;  %v738_v26 = vpop.xlane.xlu1 %737 }
 0x100   : > { %v2747_v47 = vrot.slane %v2725_v41, %v4586_v22  ;;  %v1496_v44 = vrot.slane %v4806_v62, %v4562_v13  ;;  %v1500_v45 = vrot.slane %v4806_v62, %v4568_v16  ;;  %v1504_v37 = vrot.slane %v4806_v62, %v4571_v17 }
 0x101   : > { %v2754_v46 = vrot.slane %v2726_v15, %v4586_v22  ;;  %v2755_v48 = vcombine.low %v2733_v29, %v2740_v43  ;;  %v1508_v49 = vrot.slane %v4806_v62, %v4574_v2  ;;  %v2820_v50 = vcombine.low %v2812_v27, %v2819_v63 }
 0x102   : > { %v1512_v51 = vrot.slane %v4806_v62, %v4577_v19  ;;  %v1516_v56 = vrot.slane %v4806_v62, %v4580_v20  ;;  %v1520_v53 = vrot.slane %v4806_v62, %v4583_v21  ;;  %v2870_v38 = vcombine.low %v1492_v0, %v1496_v44  ;;  %v4980_v5 = vpop.f32.mrb[0].mxu1 }
 0x103   : > { %v2756_v57 = vcombine.low %v2747_v47, %v2754_v46  ;;  %v2763_v54 = vrot.slane %v2755_v48, %v4586_v22  ;;  %v2871_v61 = vcombine.low %v1500_v45, %v1504_v37  ;;  %3467 = vperm.xlu0 %4173, %v2820_v50   ;;  %v1460_v11 = vrot.slane %v4810_v3, %v4559_v12  ;;  %v4078_v35 = vpop.f32.mrb[1].mxu1 }
 0x104   : > { %v2872_v8 = vcombine.low %v1508_v49, %v1512_v51  ;;  %v2873_v36 = vcombine.low %v1516_v56, %v1520_v53  ;;  %v1464_v18 = vrot.slane %v4810_v3, %v4562_v13  ;;  %v2880_v62 = vrot.slane %v2870_v38, %v4586_v22  ;;  %v579_v33 = vpop.f32.mrb[2].mxu1 }
 0x105   : > { %v2770_v1 = vrot.slane %v2756_v57, %v4586_v22  ;;  %v2887_v30 = vrot.slane %v2871_v61, %v4586_v22  ;;  %v1468_v32 = vrot.slane %v4810_v3, %v4568_v16  ;;  %v1472_v14 = vrot.slane %v4810_v3, %v4571_v17  ;;  %v4079_v40 = vpop.f32.mrb[3].mxu1 }
 0x106   : > { %v2894_v42 = vrot.slane %v2872_v8, %v4586_v22  ;;  %v2901_v55 = vrot.slane %v2873_v36, %v4586_v22  ;;  %v1476_v24 = vrot.slane %v4810_v3, %v4574_v2  ;;  %v1480_v27 = vrot.slane %v4810_v3, %v4577_v19 }
 0x107   : > { %v2771_v41 = vcombine.low %v2763_v54, %v2770_v1  ;;  %v2902_v0 = vcombine.low %v2880_v62, %v2887_v30  ;;  %v1484_v15 = vrot.slane %v4810_v3, %v4580_v20  ;;  %v1488_v43 = vrot.slane %v4810_v3, %v4583_v21 }
 0x108   : > { %v2903_v29 = vcombine.low %v2894_v42, %v2901_v55  ;;  %v2821_v63 = vcombine.low %v1460_v11, %v1464_v18  ;;  %v2822_v47 = vcombine.low %v1468_v32, %v1472_v14  ;;  %v2823_v45 = vcombine.low %v1476_v24, %v1480_v27 }
 0x109   : > { %3464 = vperm.xlu1 %4174, %v2771_v41   ;;  %v2910_v44 = vrot.slane %v2902_v0, %v4586_v22  ;;  %v5005_v46 = vadd.f32 %v4556_v10, %v738_v26  ;;  %v1556_v48 = vrot.slane %v4856_v25, %v4559_v12  ;;  %v2824_v49 = vcombine.low %v1484_v15, %v1488_v43 }
 0x10a   : > { %v2917_v37 = vrot.slane %v2903_v29, %v4586_v22  ;;  %v2831_v50 = vrot.slane %v2821_v63, %v4586_v22  ;;  %v2838_v51 = vrot.slane %v2822_v47, %v4586_v22  ;;  %v2845_v3 = vrot.slane %v2823_v45, %v4586_v22  ;;  %v741_v29 = vpop.xlane.xlu0 %740 }
 0x10b   : > { %v1560_v56 = vrot.slane %v4856_v25, %v4562_v13  ;;  %v1564_v53 = vrot.slane %v4856_v25, %v4568_v16  ;;  %v1568_v57 = vrot.slane %v4856_v25, %v4571_v17  ;;  %v2852_v38 = vrot.slane %v2824_v49, %v4586_v22 }
 0x10c   : > { %v2918_v54 = vcombine.low %v2910_v44, %v2917_v37  ;;  %v2853_v61 = vcombine.low %v2831_v50, %v2838_v51  ;;  %v1572_v8 = vrot.slane %v4856_v25, %v4574_v2  ;;  %v1576_v36 = vrot.slane %v4856_v25, %v4577_v19 }
 0x10d   : > { %v1580_v11 = vrot.slane %v4856_v25, %v4580_v20  ;;  %v1584_v18 = vrot.slane %v4856_v25, %v4583_v21  ;;  %v2968_v35 = vcombine.low %v1556_v48, %v1560_v56  ;;  %v2854_v1 = vcombine.low %v2845_v3, %v2852_v38 }
 0x10e   : > { %3473 = vperm.xlu0 %4173, %v2918_v54   ;;  %v2861_v62 = vrot.slane %v2853_v61, %v4586_v22  ;;  %v2969_v30 = vcombine.low %v1564_v53, %v1568_v57  ;;  %v1524_v32 = vrot.slane %v4861_v34, %v4559_v12  ;;  %v2970_v33 = vcombine.low %v1572_v8, %v1576_v36 }
 0x10f   : > { %v2971_v42 = vcombine.low %v1580_v11, %v1584_v18  ;;  %v2978_v55 = vrot.slane %v2968_v35, %v4586_v22  ;;  %v1528_v14 = vrot.slane %v4861_v34, %v4562_v13  ;;  %v2868_v24 = vrot.slane %v2854_v1, %v4586_v22  ;;  %v5046_v43 = vpop.f32.mrb[0].mxu0 }
 0x110   : > { %v2985_v25 = vrot.slane %v2969_v30, %v4586_v22  ;;  %v1532_v26 = vrot.slane %v4861_v34, %v4568_v16  ;;  %v1536_v40 = vrot.slane %v4861_v34, %v4571_v17  ;;  %v2992_v41 = vrot.slane %v2970_v33, %v4586_v22  ;;  %v5052_v48 = vpop.f32.mrb[1].mxu0 }
 0x111   : > { %v2999_v0 = vrot.slane %v2971_v42, %v4586_v22  ;;  %v1540_v27 = vrot.slane %v4861_v34, %v4574_v2  ;;  %v1544_v15 = vrot.slane %v4861_v34, %v4577_v19  ;;  %v2869_v63 = vcombine.low %v2861_v62, %v2868_v24  ;;  %v4046_v3 = vpop.f32.mrb[2].mxu0 }
 0x112   : > { %v3000_v47 = vcombine.low %v2978_v55, %v2985_v25  ;;  %v1548_v44 = vrot.slane %v4861_v34, %v4580_v20  ;;  %v1552_v45 = vrot.slane %v4861_v34, %v4583_v21  ;;  %v2919_v49 = vcombine.low %v1524_v32, %v1528_v14  ;;  %v4047_v38 = vpop.f32.mrb[3].mxu0 }
 0x113   : > { %v3001_v37 = vcombine.low %v2992_v41, %v2999_v0  ;;  %v2920_v50 = vcombine.low %v1532_v26, %v1536_v40  ;;  %v2921_v51 = vcombine.low %v1540_v27, %v1544_v15  ;;  %3470 = vperm.xlu1 %4174, %v2869_v63   ;;  %v5056_v57 = vadd.f32 %v4556_v10, %v741_v29 }
 0x114   : > { %v3008_v56 = vrot.slane %v3000_v47, %v4586_v22  ;;  %v2922_v53 = vcombine.low %v1548_v44, %v1552_v45  ;;  %v1620_v54 = vrot.slane %v4905_v23, %v4559_v12  ;;  %v2929_v61 = vrot.slane %v2919_v49, %v4586_v22  ;;  %v744_v45 = vpop.xlane.xlu1 %743 }
 0x115   : > { %v3015_v34 = vrot.slane %v3001_v37, %v4586_v22  ;;  %v2936_v8 = vrot.slane %v2920_v50, %v4586_v22  ;;  %v2943_v36 = vrot.slane %v2921_v51, %v4586_v22  ;;  %v1624_v18 = vrot.slane %v4905_v23, %v4562_v13 }
 0x116   : > { %v2950_v11 = vrot.slane %v2922_v53, %v4586_v22  ;;  %v1628_v35 = vrot.slane %v4905_v23, %v4568_v16  ;;  %v1632_v1 = vrot.slane %v4905_v23, %v4571_v17  ;;  %v1636_v32 = vrot.slane %v4905_v23, %v4574_v2 }
 0x117   : > { %v3016_v62 = vcombine.low %v3008_v56, %v3015_v34  ;;  %v2951_v30 = vcombine.low %v2929_v61, %v2936_v8  ;;  %v1640_v33 = vrot.slane %v4905_v23, %v4577_v19  ;;  %v1644_v55 = vrot.slane %v4905_v23, %v4580_v20 }
 0x118   : > { %v2952_v42 = vcombine.low %v2943_v36, %v2950_v11  ;;  %v1648_v14 = vrot.slane %v4905_v23, %v4583_v21  ;;  %v3066_v24 = vcombine.low %v1620_v54, %v1624_v18  ;;  %v3067_v26 = vcombine.low %v1628_v35, %v1632_v1 }
 0x119   : > { %3479 = vperm.xlu0 %4173, %v3016_v62   ;;  %v2959_v25 = vrot.slane %v2951_v30, %v4586_v22  ;;  %v3068_v40 = vcombine.low %v1636_v32, %v1640_v33  ;;  %v1588_v41 = vrot.slane %v4908_v4, %v4559_v12  ;;  %v1592_v29 = vrot.slane %v4908_v4, %v4562_v13 }
 0x11a   : > { %v2966_v0 = vrot.slane %v2952_v42, %v4586_v22  ;;  %v3069_v27 = vcombine.low %v1644_v55, %v1648_v14  ;;  %v3076_v15 = vrot.slane %v3066_v24, %v4586_v22  ;;  %v3083_v63 = vrot.slane %v3067_v26, %v4586_v22 }
 0x11b   : > { %v3090_v23 = vrot.slane %v3068_v40, %v4586_v22  ;;  %v1596_v47 = vrot.slane %v4908_v4, %v4568_v16  ;;  %v1600_v44 = vrot.slane %v4908_v4, %v4571_v17  ;;  %v1604_v50 = vrot.slane %v4908_v4, %v4574_v2 }
 0x11c   : > { %v2967_v37 = vcombine.low %v2959_v25, %v2966_v0  ;;  %v3097_v49 = vrot.slane %v3069_v27, %v4586_v22  ;;  %v1608_v51 = vrot.slane %v4908_v4, %v4577_v19  ;;  %v3098_v3 = vcombine.low %v3076_v15, %v3083_v63 }
 0x11d   : > { %v1612_v56 = vrot.slane %v4908_v4, %v4580_v20  ;;  %v1616_v53 = vrot.slane %v4908_v4, %v4583_v21  ;;  %v3017_v54 = vcombine.low %v1588_v41, %v1592_v29  ;;  %v3018_v34 = vcombine.low %v1596_v47, %v1600_v44 }
 0x11e   : > { %3476 = vperm.xlu1 %4174, %v2967_v37   ;;  %v3099_v38 = vcombine.low %v3090_v23, %v3097_v49  ;;  %v3019_v61 = vcombine.low %v1604_v50, %v1608_v51  ;;  %v5102_v8 = vadd.f32 %v4556_v10, %v744_v45  ;;  %v3106_v36 = vrot.slane %v3098_v3, %v4586_v22  ;;  %v747_v3 = vpop.xlane.xlu0 %746 }
 0x11f   : > { %v3020_v11 = vcombine.low %v1612_v56, %v1616_v53  ;;  %v3027_v18 = vrot.slane %v3017_v54, %v4586_v22  ;;  %v1140_v35 = vrot.slane %v4663_v60, %v4559_v12  ;;  %v3034_v4 = vrot.slane %v3018_v34, %v4586_v22  ;;  %v3724_v34 = vld [vmem:[%s5528_s5 + $0x20] sm:$0xff] }
 0x120   : > { %v3113_v1 = vrot.slane %v3099_v38, %v4586_v22  ;;  %v3041_v62 = vrot.slane %v3019_v61, %v4586_v22  ;;  %v1144_v30 = vrot.slane %v4663_v60, %v4562_v13  ;;  %v1148_v33 = vrot.slane %v4663_v60, %v4568_v16  ;;  %v3725_v61 = vld [vmem:[%s5528_s5 + $0x28] sm:$0xff] }
 0x121   : > { %v3048_v32 = vrot.slane %v3020_v11, %v4586_v22  ;;  %v1152_v42 = vrot.slane %v4663_v60, %v4571_v17  ;;  %v1156_v55 = vrot.slane %v4663_v60, %v4574_v2  ;;  %v3049_v24 = vcombine.low %v3027_v18, %v3034_v4 }
 0x122   : > { %v3114_v14 = vcombine.low %v3106_v36, %v3113_v1  ;;  %v1160_v25 = vrot.slane %v4663_v60, %v4577_v19  ;;  %v1164_v26 = vrot.slane %v4663_v60, %v4580_v20  ;;  %v1168_v41 = vrot.slane %v4663_v60, %v4583_v21 }
 0x123   : > { %v3050_v40 = vcombine.low %v3041_v62, %v3048_v32  ;;  %v2331_v0 = vcombine.low %v1140_v35, %v1144_v30  ;;  %v2332_v27 = vcombine.low %v1148_v33, %v1152_v42  ;;  %v3057_v15 = vrot.slane %v3049_v24, %v4586_v22 }
 0x124   : > { %3485 = vperm.xlu0 %4173, %v3114_v14   ;;  %v2333_v29 = vcombine.low %v1156_v55, %v1160_v25  ;;  %v1652_v63 = vrot.slane %v4955_v28, %v4559_v12  ;;  %v1656_v23 = vrot.slane %v4955_v28, %v4562_v13  ;;  %v2334_v44 = vcombine.low %v1164_v26, %v1168_v41 }
 0x125   : > { %v3064_v47 = vrot.slane %v3050_v40, %v4586_v22  ;;  %v2341_v45 = vrot.slane %v2331_v0, %v4586_v22  ;;  %v2348_v37 = vrot.slane %v2332_v27, %v4586_v22  ;;  %v1660_v49 = vrot.slane %v4955_v28, %v4568_v16 }
 0x126   : > { %v2355_v60 = vrot.slane %v2333_v29, %v4586_v22  ;;  %v1664_v50 = vrot.slane %v4955_v28, %v4571_v17  ;;  %v1668_v51 = vrot.slane %v4955_v28, %v4574_v2  ;;  %v2362_v53 = vrot.slane %v2334_v44, %v4586_v22 }
 0x127   : > { %v3065_v56 = vcombine.low %v3057_v15, %v3064_v47  ;;  %v2363_v54 = vcombine.low %v2341_v45, %v2348_v37  ;;  %v1672_v38 = vrot.slane %v4955_v28, %v4577_v19  ;;  %v1676_v36 = vrot.slane %v4955_v28, %v4580_v20 }
 0x128   : > { %v1680_v11 = vrot.slane %v4955_v28, %v4583_v21  ;;  %v3115_v18 = vcombine.low %v1652_v63, %v1656_v23  ;;  %v3116_v35 = vcombine.low %v1660_v49, %v1664_v50  ;;  %v2364_v1 = vcombine.low %v2355_v60, %v2362_v53 }
 0x129   : > { %3482 = vperm.xlu1 %4174, %v3065_v56   ;;  %v2371_v4 = vrot.slane %v2363_v54, %v4586_v22  ;;  %v3117_v62 = vcombine.low %v1668_v51, %v1672_v38  ;;  %v5156_v30 = vadd.f32 %v4556_v10, %v747_v3  ;;  %v4117_v55 = vpack.c.bf16 %v3725_v61, %v3724_v34  ;;  %v3716_v61 = vld [vmem:[%s5527_s4] sm:$0xff] }
 0x12a   : > { %v3118_v32 = vcombine.low %v1676_v36, %v1680_v11  ;;  %v3125_v33 = vrot.slane %v3115_v18, %v4586_v22  ;;  %v3132_v42 = vrot.slane %v3116_v35, %v4586_v22  ;;  %v2378_v14 = vrot.slane %v2364_v1, %v4586_v22  ;;  %v3717_v36 = vld [vmem:[%s5527_s4 + $0x8] sm:$0xff]  ;;  %v750_v11 = vpop.xlane.xlu1 %749 }
 0x12b   : > { %v3139_v28 = vrot.slane %v3117_v62, %v4586_v22  ;;  %v1172_v24 = vrot.slane %v4683_v9, %v4559_v12  ;;  %v1176_v25 = vrot.slane %v4683_v9, %v4562_v13  ;;  %4118 = vmatpush3.bf16.msra.mxu1 %v4117_v55  ;;  %v1180_v41 = vrot.slane %v4683_v9, %v4568_v16 }
 0x12c   : > { %v3146_v26 = vrot.slane %v3118_v32, %v4586_v22  ;;  %v3147_v40 = vcombine.low %v3125_v33, %v3132_v42  ;;  %v1184_v0 = vrot.slane %v4683_v9, %v4571_v17  ;;  %v2379_v27 = vcombine.low %v2371_v4, %v2378_v14  ;;  %4119 = vmatprep.subr.bf16.mxu1 %v4279_v59 }
 0x12d   : > { %v1188_v15 = vrot.slane %v4683_v9, %v4574_v2  ;;  %v1192_v29 = vrot.slane %v4683_v9, %v4577_v19  ;;  %v1196_v63 = vrot.slane %v4683_v9, %v4580_v20  ;;  %v1200_v44 = vrot.slane %v4683_v9, %v4583_v21 }
 0x12e   : > { %v3148_v23 = vcombine.low %v3139_v28, %v3146_v26  ;;  %v3155_v47 = vrot.slane %v3147_v40, %v4586_v22  ;;  %v2380_v45 = vcombine.low %v1172_v24, %v1176_v25  ;;  %3440 = vperm.xlu1 %4174, %v2379_v27   ;;  %v2381_v37 = vcombine.low %v1180_v41, %v1184_v0  ;;  %v3726_v25 = vld [vmem:[%s5528_s5 + $0x30] sm:$0xff]  ;;  %v3727_v26 = vld [vmem:[%s5528_s5 + $0x38] sm:$0xff] }
 0x12f   : > { %v2382_v60 = vcombine.low %v1188_v15, %v1192_v29  ;;  %v1684_v49 = vrot.slane %v5005_v46, %v4559_v12  ;;  %v1688_v50 = vrot.slane %v5005_v46, %v4562_v13  ;;  %v2383_v3 = vcombine.low %v1196_v63, %v1200_v44 }
 0x130   : > { %v3162_v51 = vrot.slane %v3148_v23, %v4586_v22  ;;  %v2390_v56 = vrot.slane %v2380_v45, %v4586_v22  ;;  %v1692_v53 = vrot.slane %v5005_v46, %v4568_v16  ;;  %v2397_v9 = vrot.slane %v2381_v37, %v4586_v22 }
 0x131   : > { %v2404_v54 = vrot.slane %v2382_v60, %v4586_v22  ;;  %v1696_v38 = vrot.slane %v5005_v46, %v4571_v17  ;;  %v1700_v34 = vrot.slane %v5005_v46, %v4574_v2  ;;  %v2411_v35 = vrot.slane %v2383_v3, %v4586_v22 }
 0x132   : > { %v3163_v18 = vcombine.low %v3155_v47, %v3162_v51  ;;  %v1704_v1 = vrot.slane %v5005_v46, %v4577_v19  ;;  %v1708_v4 = vrot.slane %v5005_v46, %v4580_v20  ;;  %v2412_v62 = vcombine.low %v2390_v56, %v2397_v9 }
 0x133   : > { %v1712_v32 = vrot.slane %v5005_v46, %v4583_v21  ;;  %v3164_v33 = vcombine.low %v1684_v49, %v1688_v50  ;;  %v3165_v42 = vcombine.low %v1692_v53, %v1696_v38  ;;  %v2413_v55 = vcombine.low %v2404_v54, %v2411_v35 }
 0x134   : > { %3488 = vperm.xlu0 %4173, %v3163_v18   ;;  %v3166_v14 = vcombine.low %v1700_v34, %v1704_v1  ;;  %v4123_v28 = vpack.c.bf16 %v3717_v36, %v3716_v61  ;;  %v5209_v24 = vadd.f32 %v4556_v10, %v750_v11  ;;  %v2420_v40 = vrot.slane %v2412_v62, %v4586_v22  ;;  %v3719_v62 = vld [vmem:[%s5527_s4 + $0x18] sm:$0xff] }
 0x135   : > { %v3167_v46 = vcombine.low %v1708_v4, %v1712_v32  ;;  %v3174_v41 = vrot.slane %v3164_v33, %v4586_v22  ;;  %v3181_v0 = vrot.slane %v3165_v42, %v4586_v22  ;;  %v2427_v27 = vrot.slane %v2413_v55, %v4586_v22  ;;  %v3718_v4 = vld [vmem:[%s5527_s4 + $0x10] sm:$0xff] }
 0x136   : > { %v3188_v10 = vrot.slane %v3166_v14, %v4586_v22  ;;  %4124 = vmatpush3.bf16.msra.mxu0 %v4123_v28  ;;  %v582_v15 = vmul.f32 0.015625, %v4980_v5  ;;  %v4045_v29 = vadd.f32 %v5052_v48, %v5046_v43  ;;  %v4120_v47 = vpack.c.bf16 %v3727_v26, %v3726_v25 }
 0x137   : > { %v3195_v63 = vrot.slane %v3167_v46, %v4586_v22  ;;  %v3196_v23 = vcombine.low %v3174_v41, %v3181_v0  ;;  %4125 = vmatprep.subr.bf16.mxu0 %v4279_v59  ;;  %v1204_v44 = vrot.slane %v4687_v39, %v4559_v12  ;;  %v2428_v45 = vcombine.low %v2420_v40, %v2427_v27 }
 0x138   : > { %v513_v37 = vmul.f32 0.00390625, %v4045_v29  ;;  %v1208_v60 = vrot.slane %v4687_v39, %v4562_v13  ;;  %v1212_v5 = vrot.slane %v4687_v39, %v4568_v16  ;;  %4121 = vmatpush3.bf16.msra.mxu1 %v4120_v47  ;;  %v1216_v48 = vrot.slane %v4687_v39, %v4571_v17 }
 0x139   : > { %v3197_v49 = vcombine.low %v3188_v10, %v3195_v63  ;;  %v3204_v43 = vrot.slane %v3196_v23, %v4586_v22  ;;  %v1220_v59 = vrot.slane %v4687_v39, %v4574_v2  ;;  %3443 = vperm.xlu1 %4174, %v2428_v45   ;;  %v1224_v50 = vrot.slane %v4687_v39, %v4577_v19 }
 0x13a   : > { %v1228_v51 = vrot.slane %v4687_v39, %v4580_v20  ;;  %v1232_v3 = vrot.slane %v4687_v39, %v4583_v21  ;;  %v2429_v56 = vcombine.low %v1204_v44, %v1208_v60  ;;  %v2430_v9 = vcombine.low %v1212_v5, %v1216_v48 }
 0x13b   : > { %v3211_v53 = vrot.slane %v3197_v49, %v4586_v22  ;;  %v1716_v54 = vrot.slane %v5056_v57, %v4559_v12  ;;  %v1720_v38 = vrot.slane %v5056_v57, %v4562_v13  ;;  %v2431_v34 = vcombine.low %v1220_v59, %v1224_v50  ;;  %4097 = vmatmul.mubr.msk.f32.vlgmr.msra.gmra.mrb[4].mxu1 %vm538_vm2, %v582_v15 }
 0x13c   : > { %v2432_v61 = vcombine.low %v1228_v51, %v1232_v3  ;;  %v2439_v36 = vrot.slane %v2429_v56, %v4586_v22  ;;  %v1724_v11 = vrot.slane %v5056_v57, %v4568_v16  ;;  %v2446_v18 = vrot.slane %v2430_v9, %v4586_v22 }
 0x13d   : > { %v3212_v39 = vcombine.low %v3204_v43, %v3211_v53  ;;  %v1728_v35 = vrot.slane %v5056_v57, %v4571_v17  ;;  %v1732_v1 = vrot.slane %v5056_v57, %v4574_v2  ;;  %v2453_v32 = vrot.slane %v2431_v34, %v4586_v22 }
 0x13e   : > { %v2460_v33 = vrot.slane %v2432_v61, %v4586_v22  ;;  %v1736_v42 = vrot.slane %v5056_v57, %v4577_v19  ;;  %v1740_v55 = vrot.slane %v5056_v57, %v4580_v20  ;;  %v2461_v14 = vcombine.low %v2439_v36, %v2446_v18 }
 0x13f   : > { %3491 = vperm.xlu0 %4173, %v3212_v39   ;;  %v1744_v28 = vrot.slane %v5056_v57, %v4583_v21  ;;  %v3213_v25 = vcombine.low %v1716_v54, %v1720_v38  ;;  %v3214_v26 = vcombine.low %v1724_v11, %v1728_v35  ;;  %v4126_v41 = vpack.c.bf16 %v3719_v62, %v3718_v4 }
 0x140   : > { %v2462_v40 = vcombine.low %v2453_v32, %v2460_v33  ;;  %v3215_v46 = vcombine.low %v1732_v1, %v1736_v42  ;;  %v1236_v0 = vrot.slane %v4701_v52, %v4559_v12  ;;  %v2469_v27 = vrot.slane %v2461_v14, %v4586_v22 }
 0x141   : > { %v3216_v10 = vcombine.low %v1740_v55, %v1744_v28  ;;  %v3223_v15 = vrot.slane %v3213_v25, %v4586_v22  ;;  %v3230_v29 = vrot.slane %v3214_v26, %v4586_v22  ;;  %4127 = vmatpush3.bf16.msra.mxu0 %v4126_v41  ;;  %v1240_v57 = vrot.slane %v4701_v52, %v4562_v13 }
 0x142   : > { %v2476_v63 = vrot.slane %v2462_v40, %v4586_v22  ;;  %v3237_v23 = vrot.slane %v3215_v46, %v4586_v22  ;;  %v1244_v47 = vrot.slane %v4701_v52, %v4568_v16  ;;  %v1248_v60 = vrot.slane %v4701_v52, %v4571_v17 }
 0x143   : > { %v3244_v44 = vrot.slane %v3216_v10, %v4586_v22  ;;  %v3245_v45 = vcombine.low %v3223_v15, %v3230_v29  ;;  %v1252_v5 = vrot.slane %v4701_v52, %v4574_v2  ;;  %v1256_v43 = vrot.slane %v4701_v52, %v4577_v19 }
 0x144   : > { %v2477_v49 = vcombine.low %v2469_v27, %v2476_v63  ;;  %v1260_v48 = vrot.slane %v4701_v52, %v4580_v20  ;;  %v1264_v59 = vrot.slane %v4701_v52, %v4583_v21  ;;  %v2478_v3 = vcombine.low %v1236_v0, %v1240_v57  ;;  %4108 = vmatmul.mubr.msk.f32.vlgmr.msra.gmra.mrb[4].mxu0 %vm654_vm1, %v513_v37 }
 0x145   : > { %v3246_v50 = vcombine.low %v3237_v23, %v3244_v44  ;;  %v3253_v51 = vrot.slane %v3245_v45, %v4586_v22  ;;  %v2479_v56 = vcombine.low %v1244_v47, %v1248_v60  ;;  %v2480_v53 = vcombine.low %v1252_v5, %v1256_v43 }
 0x146   : > { %3446 = vperm.xlu1 %4174, %v2477_v49   ;;  %v2481_v9 = vcombine.low %v1260_v48, %v1264_v59  ;;  %v1748_v54 = vrot.slane %v5102_v8, %v4559_v12  ;;  %v1752_v38 = vrot.slane %v5102_v8, %v4562_v13  ;;  %v2488_v52 = vrot.slane %v2478_v3, %v4586_v22 }
 0x147   : > { %v3260_v34 = vrot.slane %v3246_v50, %v4586_v22  ;;  %v2495_v61 = vrot.slane %v2479_v56, %v4586_v22  ;;  %v1756_v36 = vrot.slane %v5102_v8, %v4568_v16  ;;  %v2502_v37 = vrot.slane %v2480_v53, %v4586_v22 }
 0x148   : > { %v2509_v11 = vrot.slane %v2481_v9, %v4586_v22  ;;  %v1760_v39 = vrot.slane %v5102_v8, %v4571_v17  ;;  %v1764_v18 = vrot.slane %v5102_v8, %v4574_v2  ;;  %v1768_v4 = vrot.slane %v5102_v8, %v4577_v19 }
 0x149   : > { %v3261_v35 = vcombine.low %v3253_v51, %v3260_v34  ;;  %v2510_v1 = vcombine.low %v2488_v52, %v2495_v61  ;;  %v1772_v62 = vrot.slane %v5102_v8, %v4580_v20  ;;  %v1776_v33 = vrot.slane %v5102_v8, %v4583_v21 }
 0x14a   : > { %v2511_v32 = vcombine.low %v2502_v37, %v2509_v11  ;;  %v3262_v42 = vcombine.low %v1748_v54, %v1752_v38  ;;  %v3263_v55 = vcombine.low %v1756_v36, %v1760_v39  ;;  %v3264_v28 = vcombine.low %v1764_v18, %v1768_v4 }
 0x14b   : > { %3494 = vperm.xlu0 %4173, %v3261_v35   ;;  %v2518_v14 = vrot.slane %v2510_v1, %v4586_v22  ;;  %v1268_v25 = vrot.slane %v4706_v58, %v4559_v12  ;;  %v1272_v26 = vrot.slane %v4706_v58, %v4562_v13  ;;  %v3265_v46 = vcombine.low %v1772_v62, %v1776_v33 }
 0x14c   : > { %v2525_v40 = vrot.slane %v2511_v32, %v4586_v22  ;;  %v3272_v41 = vrot.slane %v3262_v42, %v4586_v22  ;;  %v3279_v0 = vrot.slane %v3263_v55, %v4586_v22  ;;  %v3286_v8 = vrot.slane %v3264_v28, %v4586_v22 }
 0x14d   : > { %v1276_v27 = vrot.slane %v4706_v58, %v4568_v16  ;;  %v1280_v10 = vrot.slane %v4706_v58, %v4571_v17  ;;  %v1284_v15 = vrot.slane %v4706_v58, %v4574_v2  ;;  %v3293_v63 = vrot.slane %v3265_v46, %v4586_v22 }
 0x14e   : > { %v2526_v29 = vcombine.low %v2518_v14, %v2525_v40  ;;  %v3294_v23 = vcombine.low %v3272_v41, %v3279_v0  ;;  %v1288_v57 = vrot.slane %v4706_v58, %v4577_v19  ;;  %v1292_v47 = vrot.slane %v4706_v58, %v4580_v20 }
 0x14f   : > { %v1296_v44 = vrot.slane %v4706_v58, %v4583_v21  ;;  %v2527_v45 = vcombine.low %v1268_v25, %v1272_v26  ;;  %v2528_v60 = vcombine.low %v1276_v27, %v1280_v10  ;;  %v3295_v5 = vcombine.low %v3286_v8, %v3293_v63 }
 0x150   : > { %3449 = vperm.xlu1 %4174, %v2526_v29   ;;  %v3302_v49 = vrot.slane %v3294_v23, %v4586_v22  ;;  %v2529_v43 = vcombine.low %v1284_v15, %v1288_v57  ;;  %v1780_v48 = vrot.slane %v5156_v30, %v4559_v12  ;;  %v1784_v3 = vrot.slane %v5156_v30, %v4562_v13 }
 0x151   : > { %v2530_v59 = vcombine.low %v1292_v47, %v1296_v44  ;;  %v2537_v50 = vrot.slane %v2527_v45, %v4586_v22  ;;  %v2544_v51 = vrot.slane %v2528_v60, %v4586_v22  ;;  %v3309_v58 = vrot.slane %v3295_v5, %v4586_v22 }
 0x152   : > { %v2551_v56 = vrot.slane %v2529_v43, %v4586_v22  ;;  %v1788_v53 = vrot.slane %v5156_v30, %v4568_v16  ;;  %v1792_v9 = vrot.slane %v5156_v30, %v4571_v17  ;;  %v1796_v34 = vrot.slane %v5156_v30, %v4574_v2 }
 0x153   : > { %v2558_v54 = vrot.slane %v2530_v59, %v4586_v22  ;;  %v2559_v38 = vcombine.low %v2537_v50, %v2544_v51  ;;  %v1800_v52 = vrot.slane %v5156_v30, %v4577_v19  ;;  %v3310_v61 = vcombine.low %v3302_v49, %v3309_v58 }
 0x154   : > { %v1804_v36 = vrot.slane %v5156_v30, %v4580_v20  ;;  %v1808_v37 = vrot.slane %v5156_v30, %v4583_v21  ;;  %v3311_v11 = vcombine.low %v1780_v48, %v1784_v3  ;;  %v3312_v35 = vcombine.low %v1788_v53, %v1792_v9 }
 0x155   : > { %v2560_v39 = vcombine.low %v2551_v56, %v2558_v54  ;;  %v2567_v18 = vrot.slane %v2559_v38, %v4586_v22  ;;  %v3313_v1 = vcombine.low %v1796_v34, %v1800_v52  ;;  %3497 = vperm.xlu0 %4173, %v3310_v61   ;;  %v1300_v32 = vrot.slane %v4721_v31, %v4559_v12 }
 0x156   : > { %v3314_v4 = vcombine.low %v1804_v36, %v1808_v37  ;;  %v3321_v62 = vrot.slane %v3311_v11, %v4586_v22  ;;  %v1304_v33 = vrot.slane %v4721_v31, %v4562_v13  ;;  %v3328_v30 = vrot.slane %v3312_v35, %v4586_v22  ;;  %v3414_v36 = vpop.permute.xlu1 %3413 }
 0x157   : > { %v2574_v42 = vrot.slane %v2560_v39, %v4586_v22  ;;  %v3335_v55 = vrot.slane %v3313_v1, %v4586_v22  ;;  %v1308_v14 = vrot.slane %v4721_v31, %v4568_v16  ;;  %v1312_v25 = vrot.slane %v4721_v31, %v4571_v17 }
 0x158   : > { %v3342_v28 = vrot.slane %v3314_v4, %v4586_v22  ;;  %v1316_v26 = vrot.slane %v4721_v31, %v4574_v2  ;;  %v1320_v40 = vrot.slane %v4721_v31, %v4577_v19  ;;  %v3343_v41 = vcombine.low %v3321_v62, %v3328_v30 }
 0x159   : > { %v2575_v46 = vcombine.low %v2567_v18, %v2574_v42  ;;  %v1324_v0 = vrot.slane %v4721_v31, %v4580_v20  ;;  %v1328_v8 = vrot.slane %v4721_v31, %v4583_v21  ;;  %v2576_v10 = vcombine.low %v1300_v32, %v1304_v33 }
 0x15a   : > { %v3344_v27 = vcombine.low %v3335_v55, %v3342_v28  ;;  %v2577_v15 = vcombine.low %v1308_v14, %v1312_v25  ;;  %v2578_v29 = vcombine.low %v1316_v26, %v1320_v40  ;;  %v3351_v63 = vrot.slane %v3343_v41, %v4586_v22  ;;  %v3417_v37 = vpop.permute.xlu1 %3416 }
 0x15b   : > { %3452 = vperm.xlu1 %4174, %v2575_v46   ;;  %v2579_v23 = vcombine.low %v1324_v0, %v1328_v8  ;;  %v1812_v57 = vrot.slane %v5209_v24, %v4559_v12  ;;  %v1816_v47 = vrot.slane %v5209_v24, %v4562_v13  ;;  %v2586_v45 = vrot.slane %v2576_v10, %v4586_v22 }
 0x15c   : > { %v3358_v44 = vrot.slane %v3344_v27, %v4586_v22  ;;  %v2593_v31 = vrot.slane %v2577_v15, %v4586_v22  ;;  %v2600_v60 = vrot.slane %v2578_v29, %v4586_v22  ;;  %v1820_v49 = vrot.slane %v5209_v24, %v4568_v16 }
 0x15d   : > { %v2607_v5 = vrot.slane %v2579_v23, %v4586_v22  ;;  %v1824_v43 = vrot.slane %v5209_v24, %v4571_v17  ;;  %v1828_v12 = vrot.slane %v5209_v24, %v4574_v2  ;;  %v1832_v59 = vrot.slane %v5209_v24, %v4577_v19 }
 0x15e   : > { %v3359_v13 = vcombine.low %v3351_v63, %v3358_v44  ;;  %v2608_v48 = vcombine.low %v2586_v45, %v2593_v31  ;;  %v1836_v50 = vrot.slane %v5209_v24, %v4580_v20  ;;  %v1840_v3 = vrot.slane %v5209_v24, %v4583_v21  ;;  %v3420_v11 = vpop.permute.xlu1 %3419 }
 0x15f   : > { %v2609_v51 = vcombine.low %v2600_v60, %v2607_v5  ;;  %v3360_v58 = vcombine.low %v1812_v57, %v1816_v47  ;;  %v3361_v16 = vcombine.low %v1820_v49, %v1824_v43  ;;  %v3362_v56 = vcombine.low %v1828_v12, %v1832_v59 }
 0x160   : > { %3500 = vperm.xlu0 %4173, %v3359_v13   ;;  %v2616_v17 = vrot.slane %v2608_v48, %v4586_v22  ;;  %v3363_v53 = vcombine.low %v1836_v50, %v1840_v3  ;;  %v3411_v4 = vpop.permute.xlu0 %3410  ;;  %v5424_v55 = vand.u32 127, %v817_v6  ;;  %vm3614_vm1 = vcmask 1048512  }
 0x161   : > { %v2623_v2 = vrot.slane %v2609_v51, %v4586_v22  ;;  %v3370_v9 = vrot.slane %v3360_v58, %v4586_v22  ;;  %v3377_v19 = vrot.slane %v3361_v16, %v4586_v22  ;;  %v3384_v54 = vrot.slane %v3362_v56, %v4586_v22 }
 0x162   : > { %v3391_v38 = vrot.slane %v3363_v53, %v4586_v22  ;;  %v3423_v39 = vpop.permute.xlu1 %3422  ;;  %v3511_v25 = vadd.s32 4294967288, %v5424_v55  ;;  %v3518_v26 = vadd.s32 4294967280, %v5424_v55  ;;  %v3509_v46 = vsub.s32 %v5424_v55, %v4553_v7 }
 0x163   : > { %v2624_v20 = vcombine.low %v2616_v17, %v2623_v2  ;;  %v3392_v34 = vcombine.low %v3370_v9, %v3377_v19  ;;  %v3525_v8 = vadd.s32 4294967272, %v5424_v55  ;;  %v3532_v29 = vadd.s32 4294967264, %v5424_v55 }
 0x164   : > { %v3393_v21 = vcombine.low %v3384_v54, %v3391_v38  ;;  %v3514_v40 = vsub.s32 %v3511_v25, %v4553_v7  ;;  %v3521_v27 = vsub.s32 %v3518_v26, %v4553_v7  ;;  %v3510_v15 = vrot.slane %v3411_v4, %v3509_v46 }
 0x165   : > { %3455 = vperm.xlu1 %4174, %v2624_v20   ;;  %v3400_v24 = vrot.slane %v3392_v34, %v4586_v22  ;;  %v3528_v63 = vsub.s32 %v3525_v8, %v4553_v7  ;;  %v3539_v31 = vadd.s32 4294967256, %v5424_v55  ;;  %v3535_v5 = vsub.s32 %v3532_v29, %v4553_v7 }
 0x166   : > { %v3407_v52 = vrot.slane %v3393_v21, %v4586_v22  ;;  %v5413_v18 = vpop.permute.xlu1 %3425  ;;  %v3515_v10 = vrot.slane %v3414_v36, %v3514_v40  ;;  %v3522_v47 = vrot.slane %v3417_v37, %v3521_v27  ;;  %v3546_v13 = vadd.s32 4294967248, %v5424_v55 }
 0x167   : > { %v3529_v43 = vrot.slane %v3420_v11, %v3528_v63  ;;  %v3542_v59 = vsub.s32 %v3539_v31, %v4553_v7  ;;  %v3536_v51 = vrot.slane %v3423_v39, %v3535_v5  ;;  %v3553_v17 = vadd.s32 4294967240, %v5424_v55 }
 0x168   : > { %v3408_v61 = vcombine.low %v3400_v24, %v3407_v52  ;;  %v3517_v60 = vsel %vm3516_vm3, %v3515_v10, %v3510_v15  ;;  %v3549_v2 = vsub.s32 %v3546_v13, %v4553_v7  ;;  %v3560_v54 = vadd.s32 4294967232, %v5424_v55 }
 0x169   : > { %v3524_v48 = vsel %vm3523_vm4, %v3522_v47, %v3517_v60  ;;  %v3543_v9 = vrot.slane %v5413_v18, %v3542_v59  ;;  %v3556_v38 = vsub.s32 %v3553_v17, %v4553_v7  ;;  %v3567_v37 = vadd.s32 4294967224, %v5424_v55 }
 0x16a   : > { %3503 = vperm.xlu0 %4173, %v3408_v61   ;;  %v5415_v35 = vpop.permute.xlu1 %3428  ;;  %v3531_v56 = vsel %vm3530_vm5, %v3529_v43, %v3524_v48  ;;  %v3563_v11 = vsub.s32 %v3560_v54, %v4553_v7  ;;  %v3588_v10 = vadd.s32 4294967200, %v5424_v55  ;;  %vm3713_vm2 = vcmp.lt.s32.totalorder %v817_v6, 256 }
 0x16b   : > { %v3538_v20 = vsel %vm3537_vm6, %v3536_v51, %v3531_v56  ;;  %v3550_v21 = vrot.slane %v5415_v35, %v3549_v2 }
 0x16c   : > { %v5421_v32 = vpop.permute.xlu0 %3437  ;;  %v3545_v36 = vsel %vm3544_vm7, %v3543_v9, %v3538_v20  ;;  %v3591_v31 = vsub.s32 %v3588_v10, %v4553_v7 }
 0x16e   : > { %v5417_v1 = vpop.permute.xlu1 %3431 }
 0x16f   : > { %v3557_v18 = vrot.slane %v5417_v1, %v3556_v38 }
 0x172   : > { %v5419_v62 = vpop.permute.xlu1 %3434 }
 0x177   : > { %v3462_v42 = vpop.permute.xlu0 %3461 }
 0x178   : > { %v3623_v57 = vrot.slane %v3462_v42, %v3514_v40  ;;  %v3574_v42 = vadd.s32 4294967216, %v5424_v55 }
 0x17a   : > { %v3577_v1 = vsub.s32 %v3574_v42, %v4553_v7 }
 0x17d   : > { %v3459_v33 = vpop.permute.xlu1 %3458 }
 0x17e   : > { %v3619_v23 = vrot.slane %v3459_v33, %v3509_v46  ;;  %v3552_v33 = vsel %vm3551_vm8, %v3550_v21, %v3545_v36  ;;  %v3581_v46 = vadd.s32 4294967208, %v5424_v55 }
 0x17f   : > { %v3559_v40 = vsel %vm3558_vm9, %v3557_v18, %v3552_v33 }
 0x180   : > { %v3624_v12 = vsel %vm3516_vm3, %v3623_v57, %v3619_v23  ;;  %vm3876_vm3 = vcmask 57344  }
 0x182   : > { %v3468_v14 = vpop.permute.xlu0 %3467 }
 0x183   : > { %v3633_v50 = vrot.slane %v3468_v14, %v3528_v63  ;;  %v3564_v14 = vrot.slane %v5419_v62, %v3563_v11  ;;  %v3584_v62 = vsub.s32 %v3581_v46, %v4553_v7 }
 0x188   : > { %v3465_v30 = vpop.permute.xlu1 %3464 }
 0x189   : > { %v3628_v49 = vrot.slane %v3465_v30, %v3521_v27  ;;  %v3570_v30 = vsub.s32 %v3567_v37, %v4553_v7  ;;  %v3566_v27 = vsel %vm3565_vm10, %v3564_v14, %v3559_v40 }
 0x18b   : > { %v3629_v3 = vsel %vm3523_vm4, %v3628_v49, %v3624_v12  ;;  %v3602_v49 = vadd.s32 4294967184, %v5424_v55 }
 0x18c   : > { %v3634_v19 = vsel %vm3530_vm5, %v3633_v50, %v3629_v3  ;;  %v3609_v3 = vadd.s32 4294967176, %v5424_v55 }
 0x18d   : > { %v3474_v41 = vpop.permute.xlu0 %3473 }
 0x18e   : > { %v3643_v34 = vrot.slane %v3474_v41, %v3542_v59  ;;  %v3612_v9 = vsub.s32 %v3609_v3, %v4553_v7 }
 0x192   : > { %v3471_v28 = vpop.permute.xlu1 %3470 }
 0x193   : > { %v3638_v53 = vrot.slane %v3471_v28, %v3535_v5 }
 0x195   : > { %v3639_v24 = vsel %vm3537_vm6, %v3638_v53, %v3634_v19 }
 0x196   : > { %v3644_v4 = vsel %vm3544_vm7, %v3643_v34, %v3639_v24 }
 0x198   : > { %v3480_v44 = vpop.permute.xlu0 %3479 }
 0x199   : > { %v3653_v35 = vrot.slane %v3480_v44, %v3556_v38  ;;  %v3595_v44 = vadd.s32 4294967192, %v5424_v55 }
 0x19b   : > { %v3598_v12 = vsub.s32 %v3595_v44, %v4553_v7 }
 0x19d   : > { %v3477_v0 = vpop.permute.xlu1 %3476 }
 0x19e   : > { %v3648_v39 = vrot.slane %v3477_v0, %v3549_v2  ;;  %v3571_v0 = vrot.slane %v5421_v32, %v3570_v30 }
 0x1a0   : > { %v3649_v28 = vsel %vm3551_vm8, %v3648_v39, %v3644_v4  ;;  %v3573_v47 = vsel %vm3572_vm11, %v3571_v0, %v3566_v27 }
 0x1a1   : > { %v3654_v8 = vsel %vm3558_vm9, %v3653_v35, %v3649_v28  ;;  %v3874_v35 = vld [vmem:[%s5529_s6] sm:$0x1] }
 0x1a3   : > { %v3486_v58 = vpop.permute.xlu0 %3485 }
 0x1a4   : > { %v3663_v15 = vrot.slane %v3486_v58, %v3570_v30 }
 0x1a8   : > { %v5435_v45 = vpop.permute.xlu1 %3482 }
 0x1a9   : > { %v3658_v41 = vrot.slane %v5435_v45, %v3563_v11 }
 0x1ab   : > { %v3659_v29 = vsel %vm3565_vm10, %v3658_v41, %v3654_v8 }
 0x1ac   : > { %v3664_v32 = vsel %vm3572_vm11, %v3663_v15, %v3659_v29 }
 0x1ad   : > { %v3441_v16 = vpop.permute.xlu1 %3440 }
 0x1ae   : > { %v3578_v63 = vrot.slane %v3441_v16, %v3577_v1  ;;  %v3605_v16 = vsub.s32 %v3602_v49, %v4553_v7 }
 0x1b0   : > { %v3580_v5 = vsel %vm3579_vm12, %v3578_v63, %v3573_v47 }
 0x1b3   : > { %v3489_v52 = vpop.permute.xlu0 %3488 }
 0x1b4   : > { %v3668_v45 = vrot.slane %v3489_v52, %v3577_v1 }
 0x1b6   : > { %v3669_v13 = vsel %vm3579_vm12, %v3668_v45, %v3664_v32 }
 0x1b8   : > { %v3444_v61 = vpop.permute.xlu1 %3443 }
 0x1b9   : > { %v3585_v60 = vrot.slane %v3444_v61, %v3584_v62 }
 0x1bb   : > { %v3587_v51 = vsel %vm3586_vm13, %v3585_v60, %v3580_v5 }
 0x1be   : > { %v3492_v25 = vpop.permute.xlu0 %3491 }
 0x1bf   : > { %v3673_v43 = vrot.slane %v3492_v25, %v3584_v62 }
 0x1c1   : > { %v3674_v17 = vsel %vm3586_vm13, %v3673_v43, %v3669_v13 }
 0x1c5   : > { %v3447_v26 = vpop.permute.xlu1 %3446 }
 0x1c6   : > { %v3592_v48 = vrot.slane %v3447_v26, %v3591_v31 }
 0x1c8   : > { %v3594_v2 = vsel %vm3593_vm14, %v3592_v48, %v3587_v51 }
 0x1ca   : > { %v3495_v23 = vpop.permute.xlu0 %3494 }
 0x1cb   : > { %v3678_v58 = vrot.slane %v3495_v23, %v3591_v31 }
 0x1cd   : > { %v3679_v19 = vsel %vm3593_vm14, %v3678_v58, %v3674_v17 }
 0x1cf   : > { %v3450_v57 = vpop.permute.xlu1 %3449 }
 0x1d0   : > { %v3599_v56 = vrot.slane %v3450_v57, %v3598_v12 }
 0x1d2   : > { %v3601_v34 = vsel %vm3600_vm15, %v3599_v56, %v3594_v2 }
 0x1d4   : > { %v3498_v59 = vpop.permute.xlu0 %3497 }
 0x1d5   : > { %v3683_v53 = vrot.slane %v3498_v59, %v3598_v12 }
 0x1d7   : > { %v3684_v24 = vsel %vm3600_vm15, %v3683_v53, %v3679_v19 }
 0x1da   : > { %v3453_v50 = vpop.permute.xlu1 %3452 }
 0x1db   : > { %v3606_v54 = vrot.slane %v3453_v50, %v3605_v16 }
 0x1dd   : > { %v3608_v52 = vsel %vm3607_vm0, %v3606_v54, %v3601_v34 }
 0x1df   : > { %v3501_v20 = vpop.permute.xlu0 %3500 }
 0x1e0   : > { %v3688_v21 = vrot.slane %v3501_v20, %v3605_v16 }
 0x1e2   : > { %v3689_v61 = vsel %vm3607_vm0, %v3688_v21, %v3684_v24 }
 0x1e4   : > { %v3456_v38 = vpop.permute.xlu1 %3455 }
 0x1e5   : > { %v3613_v55 = vrot.slane %v3456_v38, %v3612_v9 }
 0x1e7   : > { %v3615_v37 = vsel %vm3614_vm1, %v3613_v55, %v3608_v52 }
 0x1e9   : > { %v3504_v36 = vpop.permute.xlu0 %3503 }
 0x1ea   : > { %v3693_v11 = vrot.slane %v3504_v36, %v3612_v9 }
 0x1ec   : > { %v3694_v39 = vsel %vm3614_vm1, %v3693_v11, %v3689_v61 }
 0x1ed   : > { %v3695_v7 = vcombine.low %v3615_v37, %v3694_v39 }
 0x1ef   : > { %v3702_v18 = vrot.slane %v3695_v7, %v4586_v22 }
 0x1f1   : > { %v3709_v4 = vrot.slane %v3702_v18, %v4586_v22 }
 0x1f3   : > { %3715 = vst.msk [vmem:[%s334_s14] sm:$0x3] %vm3713_vm2, %v3709_v4 }
 0x20e   : > { %v3797_v33 = vpop.f32.mrb[4].mxu1 }
 0x20f   : > { %v4098_v42 = vpop.f32.mrb[5].mxu1 }
 0x217   : > { %v3870_v30 = vpop.f32.mrb[4].mxu0 }
 0x218   : > { %v3871_v14 = vadd.f32 %v3870_v30, %v3797_v33  ;;  %v4109_v28 = vpop.f32.mrb[5].mxu0 }
 0x21a   : > { %v3875_v25 = vadd.f32 %v3874_v35, %v3871_v14 }
 0x21c   : > { %3877 = vst.msk [vmem:[%s314_s22] sm:$0x1] %vm3876_vm3, %v3875_v25 }
 0x21d   : > { %4224 = shalt.err (!%p4221_p3)
}
 0x21e   : > { %s4225_s14 = scalar_lea.hbm %s5481_s26, 16  ;;  %s4229_s21 = scalar_lea.hbm %s5530_s7, 32 }
 0x21f   : > { %p4226_p4 = scmp.ne.s32.totalorder %s5481_s26, %s4225_s14  ;;  %p4230_p9 = scmp.lt.u32.totalorder %s5481_s26, %s5530_s7 }
 0x220   : > { %p4231_p10 = scmp.lt.u32.totalorder %s4229_s21, %s4225_s14  ;;  %p4233_p12 = scmp.lt.u32.totalorder %s4225_s14, %s5481_s26 }
 0x221   : > { %p4227_p7 = pnand %p4226_p4, %p4368_p5 }
 0x222   : > { %p4232_p11 = por %p4231_p10, %p4230_p9 }
 0x223   : > { %p4228_p8 = pneg %p4227_p7 }
 0x224   : > { %p4234_p13 = por %p4233_p12, %p4232_p11 }
 0x226   : > { %p4235_p0 = pnand %p4234_p13, %p4228_p8 }
 0x228   : > { %4238 = shalt.err (!%p4235_p0)
}
 0x229   : > { %4128 = dma.vmem_to_hbm [thread:$0]  (%p4368_p5), %s5483_s23, 16, %s5481_s26, %s3879_s27  }
 0x22a PF: > { %p4134_p1 = scmp.ge.s32.totalorder %s4273_s10, 2  ;;  %s3910_s24 = sand.u32 1, %s4261_s29  }
 0x22b   : > { %s3911_s25 = scalar_lea.sflag [#allocation4], %s3910_s24 }
 0x22c   : > { %p4131_p2 = pnand %p4134_p1, %p4372_p6 }
 0x22e   : > { %4256 = dma.done.wait (!%p4131_p2), %s3911_s25, 16  }
 0x22f   : > { %4258 = vsyncadd (!%p4131_p2), %s3911_s25, 4294967280  ;;  %p20_p3 = scmp.ge.s32.totalorder %s4355_s12, 4   ;;  %s5534_s29 = smov %s4265_s30 }
 0x230   : > { %s5535_s30 = smov %s4269_s9  ;;  %s5536_s9 = smov %s4366_s15 }
 0x231   : > { %s5537_s10 = smov %s4355_s12  ;;  %22 = sbr.rel (!%p20_p3) target bundleno = 5 (0x5), region = 98 }
 0x238   :  { %3922 = vsyncpa [#allocation4], 1 }
 0x239   :  { %3924 = vsyncpa [#allocation4 + $0x1], 1 }

</bundles_post_ra>
